<compile_context>
chip_gen: v5e
topology: v5e:2x2
jax: 0.10.0
libtpu: 0.0.40
codegen_flags: <defaults>
</compile_context>

<pallas_src>
import functools
from typing import NamedTuple

import jax
import jax.numpy as jnp
from jax.experimental import pallas as pl
from jax.experimental.pallas import tpu as pltpu


def _round_up(n, m):
    return ((n + m - 1) // m) * m


def _cdiv(a, b):
    return -(-a // b)


class MLPMeta(NamedTuple):
    in_dim: int    # original input feature count
    in_pad: int    # input features padded to the bf16 sublane pack (16)
    lanes: int     # padded hidden/output width (multiple of 128)
    out_dim: int   # original output feature count


def _tensorcores_per_chip():
    """2 TensorCores per JAX device on v4/v5p (megacore) and v7x; 1 on v2/v3/v5e/v6e."""
    try:
        kind = jax.devices()[0].device_kind.lower()
    except Exception:
        return 1
    if any(s in kind for s in ("v4", "v5p", "v7", "7x", "tpu7")):
        return 2
    return 1


def _choose_batch_tiling(batch, n_cores, max_tile):
    """Pick (tile_rows, padded_batch, n_tiles): 1 tile on single-TC chips, n_cores tiles on
    multi-TC chips, splitting further only if a tile would exceed max_tile rows."""
    min_tiles = n_cores if batch >= 8 * n_cores else 1
    n_tiles = max(min_tiles, _cdiv(batch, max_tile))
    tb = _round_up(_cdiv(batch, n_tiles), 8)           # f32 sublane alignment
    n_tiles = _cdiv(_round_up(batch, 8), tb)
    return tb, tb * n_tiles, n_tiles


def _mlp_softmax_kernel(x_ref, w_ref, b_ref, out_ref, *, ip, nlanes):
    """Fused 2-hidden-layer ReLU MLP + output Linear + stable softmax over the last dim."""
    x = x_ref[...].astype(jnp.bfloat16)                 # f32 -> bf16 cast hidden under input DMA

    # Static slices of the packed (VMEM-resident) weights / biases - zero runtime cost.
    w1 = w_ref[0:ip, :]
    w2 = w_ref[ip:ip + nlanes, :]
    w3 = w_ref[ip + nlanes:ip + 2 * nlanes, :]
    b1 = b_ref[0:1, :]
    b2 = b_ref[1:2, :]
    b3 = b_ref[2:3, :]

    # Hidden layer 1: Linear + ReLU (f32 accumulate / f32 elementwise, single pack to bf16).
    h1 = jnp.dot(x, w1, preferred_element_type=jnp.float32) + b1
    h1 = jnp.maximum(h1, 0.0).astype(jnp.bfloat16)

    # Hidden layer 2: Linear + ReLU.
    h2 = jnp.dot(h1, w2, preferred_element_type=jnp.float32) + b2
    h2 = jnp.maximum(h2, 0.0).astype(jnp.bfloat16)

    # Output layer (padded output lanes carry a -1e30 bias -> exp() == 0 -> softmax unchanged).
    logits = jnp.dot(h2, w3, preferred_element_type=jnp.float32) + b3

    # Numerically stable softmax; exact division (probabilities feed RL sampling / log-probs).
    m = jnp.max(logits, axis=-1, keepdims=True)
    e = jnp.exp(logits - m)
    out_ref[...] = (e / jnp.sum(e, axis=-1, keepdims=True)).astype(out_ref.dtype)


def prepare_params(params, compute_dtype=jnp.bfloat16):
    """Pad hidden/output dims to 128 lanes, pad the input dim to the bf16 sublane pack (16),
    pack the 3 weight matrices (bf16) and 3 biases (f32) into single arrays. Do this ONCE."""
    w1, b1 = params["w1"], params["b1"]
    w2, b2 = params["w2"], params["b2"]
    w3, b3 = params["w3"], params["b3"]
    in_dim, h1 = w1.shape
    _, h2 = w2.shape
    _, out_dim = w3.shape

    ip = _round_up(in_dim, 16)                                   # bf16 sublane pack only
    nlanes = max(_round_up(h1, 128), _round_up(h2, 128), _round_up(out_dim, 128))

    def pad2(a, rows, cols, fill=0.0):
        return jnp.pad(a, ((0, rows - a.shape[0]), (0, cols - a.shape[1])),
                       constant_values=fill)

    # Zero-padded hidden units contribute nothing (zero weights, relu(0)=0, zero next-layer rows).
    w_pack = jnp.concatenate(
        [pad2(w1, ip, nlanes), pad2(w2, nlanes, nlanes), pad2(w3, nlanes, nlanes)],
        axis=0).astype(compute_dtype)
    # Biases stay f32 (added to the f32 MXU accumulator); -1e30 kills padded output logits.
    b_pack = jnp.concatenate(
        [pad2(b1, 1, nlanes), pad2(b2, 1, nlanes), pad2(b3, 1, nlanes, fill=-1e30)],
        axis=0).astype(jnp.float32)

    return w_pack, b_pack, MLPMeta(in_dim=in_dim, in_pad=ip, lanes=nlanes, out_dim=out_dim)


def dnn_arch_forward(x, w_pack, b_pack, meta, n_cores=1, max_tile=1024):
    """Fused DNNArch forward.

    x:      (B, input_shape) float32 (cast to bf16 inside the kernel)
    w_pack: (in_pad + 2*lanes, lanes) bf16 packed weights
    b_pack: (3, lanes) float32 packed biases
    meta:   MLPMeta (static shape info)
    """
    batch, in_dim = x.shape
    ip, nlanes, out_dim = meta.in_pad, meta.lanes, meta.out_dim

    tb, bp, n_tiles = _choose_batch_tiling(batch, n_cores, max_tile)

    x_p = x
    if bp != batch or ip != in_dim:
        x_p = jnp.pad(x, ((0, bp - batch), (0, ip - in_dim)))   # no-op for aligned shapes

    kernel = functools.partial(_mlp_softmax_kernel, ip=ip, nlanes=nlanes)
    out = pl.pallas_call(
        kernel,
        out_shape=jax.ShapeDtypeStruct((bp, nlanes), jnp.float32),
        grid=(n_tiles,),
        in_specs=[
            # x: streamed per batch tile; last dim == full array dim (narrow contraction is fine).
            pl.BlockSpec((tb, ip), lambda i: (i, 0)),
            # Packed weights / biases: same block every grid step -> VMEM-resident, fetched once.
            pl.BlockSpec(w_pack.shape, lambda i: (0, 0)),
            pl.BlockSpec(b_pack.shape, lambda i: (0, 0)),
        ],
        out_specs=pl.BlockSpec((tb, nlanes), lambda i: (i, 0)),   # lane-dense 128-wide store
        compiler_params=pltpu.CompilerParams(
            dimension_semantics=("parallel",)),                   # shard tiles across 2 TCs on v7x
    )(x_p, w_pack, b_pack)

    return out[:batch, :out_dim]


def init_params(key, input_shape, hidden_layers_sizes, output_shape):
    """Deterministic init mimicking nn.Linear default: U(-1/sqrt(fan_in), 1/sqrt(fan_in))."""
    sizes = [input_shape] + list(hidden_layers_sizes) + [output_shape]
    params = {}
    for i in range(len(sizes) - 1):
        fan_in, fan_out = sizes[i], sizes[i + 1]
        key, kw, kb = jax.random.split(key, 3)
        bound = 1.0 / jnp.sqrt(jnp.float32(fan_in))
        # stored transposed relative to nn.Linear: (in, out)
        params[f"w{i+1}"] = jax.random.uniform(kw, (fan_in, fan_out), jnp.float32, -bound, bound)
        params[f"b{i+1}"] = jax.random.uniform(kb, (1, fan_out), jnp.float32, -bound, bound)
    return params


def reference_forward_f32(x, params):
    h = jnp.maximum(x @ params["w1"] + params["b1"], 0.0)
    h = jnp.maximum(h @ params["w2"] + params["b2"], 0.0)
    logits = h @ params["w3"] + params["b3"]
    return jax.nn.softmax(logits, axis=-1)


def reference_forward_bf16(x, params):
    """Mirrors the kernel's bf16-input / f32-accumulate matmuls."""
    def mm(a, w):
        return jnp.dot(a.astype(jnp.bfloat16), w.astype(jnp.bfloat16),
                       preferred_element_type=jnp.float32)
    h = jnp.maximum(mm(x, params["w1"]) + params["b1"], 0.0)
    h = jnp.maximum(mm(h, params["w2"]) + params["b2"], 0.0)
    logits = mm(h, params["w3"]) + params["b3"]
    return jax.nn.softmax(logits, axis=-1)


if __name__ == "__main__":
    key = jax.random.PRNGKey(0)
    key, kx = jax.random.split(key)

    input_shape = 16
    hidden_layers_sizes = [32, 32]
    output_shape = 8
    batch = 256  # amortizes launch overhead; 1 tile on v5e/v6e, 2 tiles of 128 on v7x

    x = jax.random.normal(kx, (batch, input_shape), dtype=jnp.float32)
    params = init_params(key, input_shape, hidden_layers_sizes, output_shape)
    w_pack, b_pack, meta = prepare_params(params)      # pad/pack/cast ONCE, outside the hot path

    n_cores = _tensorcores_per_chip()
    fwd = jax.jit(dnn_arch_forward, static_argnums=(3, 4, 5))
    out = jax.block_until_ready(fwd(x, w_pack, b_pack, meta, n_cores, 1024))

    assert out.shape == (batch, output_shape)

    # Tight check vs a reference matching the kernel's bf16-in / f32-acc arithmetic.
    ref_bf16 = reference_forward_bf16(x, params)
    assert jnp.allclose(out, ref_bf16, atol=5e-3), "mismatch vs bf16-matched reference"

    # Looser semantic check vs the full-f32 reference (bf16 weight quantization error).
    ref_f32 = reference_forward_f32(x, params)
    assert jnp.allclose(out, ref_f32, atol=5e-2), "mismatch vs f32 reference"

    # Exact-division softmax: rows must sum to ~1.
    assert jnp.allclose(jnp.sum(out, axis=-1), 1.0, atol=1e-4), "softmax rows must sum to 1"

    print("KERNEL_OK")
</pallas_src>

<mosaic_0001>
module attributes {stable_mosaic.version = 11 : i64} {
  func.func @_mlp_softmax_kernel(%arg0: i32, %arg1: memref<256x16xf32, #tpu.memory_space<vmem>>, %arg2: memref<272x128xbf16, #tpu.memory_space<vmem>>, %arg3: memref<3x128xf32, #tpu.memory_space<vmem>>, %arg4: memref<256x128xf32, #tpu.memory_space<vmem>>) attributes {dimension_semantics = [#tpu.dimension_semantics<parallel>], iteration_bounds = array<i64: 1>, scalar_prefetch = 0 : i64, scratch_operands = 0 : i64, tpu.core_type = #tpu.core_type<tc>, window_params = [{transform_indices = @transform_0, window_bounds = array<i64: 256, 16>}, {pipeline_mode = #tpu.pipeline_mode<synchronous>, transform_indices = @transform_1, window_bounds = array<i64: 272, 128>}, {pipeline_mode = #tpu.pipeline_mode<synchronous>, transform_indices = @transform_2, window_bounds = array<i64: 3, 128>}, {transform_indices = @transform_3, window_bounds = array<i64: 256, 128>}]} {
    %c0 = arith.constant 0 : index
    %c0_0 = arith.constant 0 : index
    %0 = vector.load %arg1[%c0, %c0_0] : memref<256x16xf32, #tpu.memory_space<vmem>>, vector<256x16xf32>
    %1 = arith.truncf %0 : vector<256x16xf32> to vector<256x16xbf16>
    %c0_1 = arith.constant 0 : index
    %c0_2 = arith.constant 0 : index
    %2 = vector.load %arg2[%c0_1, %c0_2] : memref<272x128xbf16, #tpu.memory_space<vmem>>, vector<16x128xbf16>
    %c16 = arith.constant 16 : index
    %c0_3 = arith.constant 0 : index
    %3 = vector.load %arg2[%c16, %c0_3] : memref<272x128xbf16, #tpu.memory_space<vmem>>, vector<128x128xbf16>
    %c144 = arith.constant 144 : index
    %c0_4 = arith.constant 0 : index
    %4 = vector.load %arg2[%c144, %c0_4] : memref<272x128xbf16, #tpu.memory_space<vmem>>, vector<128x128xbf16>
    %c0_5 = arith.constant 0 : index
    %c0_6 = arith.constant 0 : index
    %5 = vector.load %arg3[%c0_5, %c0_6] : memref<3x128xf32, #tpu.memory_space<vmem>>, vector<1x128xf32>
    %c1 = arith.constant 1 : index
    %c0_7 = arith.constant 0 : index
    %6 = vector.load %arg3[%c1, %c0_7] : memref<3x128xf32, #tpu.memory_space<vmem>>, vector<1x128xf32>
    %c2 = arith.constant 2 : index
    %c0_8 = arith.constant 0 : index
    %7 = vector.load %arg3[%c2, %c0_8] : memref<3x128xf32, #tpu.memory_space<vmem>>, vector<1x128xf32>
    %cst = arith.constant dense<0.000000e+00> : vector<256x128xf32>
    %8 = tpu.matmul %1, %2, %cst {dimension_numbers = #tpu.dot_dimension_numbers<[1], [0], [0], [1], [0, 0, 1, 1], [], []>} : vector<256x16xbf16>, vector<16x128xbf16>, vector<256x128xf32> -> vector<256x128xf32>
    %9 = vector.broadcast %5 : vector<1x128xf32> to vector<256x128xf32>
    %10 = arith.addf %8, %9 : vector<256x128xf32>
    %cst_9 = arith.constant 0.000000e+00 : f32
    %11 = vector.broadcast %cst_9 : f32 to vector<256x128xf32>
    %12 = arith.maximumf %10, %11 : vector<256x128xf32>
    %13 = arith.truncf %12 : vector<256x128xf32> to vector<256x128xbf16>
    %cst_10 = arith.constant dense<0.000000e+00> : vector<256x128xf32>
    %14 = tpu.matmul %13, %3, %cst_10 {dimension_numbers = #tpu.dot_dimension_numbers<[1], [0], [0], [1], [0, 0, 1, 1], [], []>} : vector<256x128xbf16>, vector<128x128xbf16>, vector<256x128xf32> -> vector<256x128xf32>
    %15 = vector.broadcast %6 : vector<1x128xf32> to vector<256x128xf32>
    %16 = arith.addf %14, %15 : vector<256x128xf32>
    %cst_11 = arith.constant 0.000000e+00 : f32
    %17 = vector.broadcast %cst_11 : f32 to vector<256x128xf32>
    %18 = arith.maximumf %16, %17 : vector<256x128xf32>
    %19 = arith.truncf %18 : vector<256x128xf32> to vector<256x128xbf16>
    %cst_12 = arith.constant dense<0.000000e+00> : vector<256x128xf32>
    %20 = tpu.matmul %19, %4, %cst_12 {dimension_numbers = #tpu.dot_dimension_numbers<[1], [0], [0], [1], [0, 0, 1, 1], [], []>} : vector<256x128xbf16>, vector<128x128xbf16>, vector<256x128xf32> -> vector<256x128xf32>
    %21 = vector.broadcast %7 : vector<1x128xf32> to vector<256x128xf32>
    %22 = arith.addf %20, %21 : vector<256x128xf32>
    %cst_13 = arith.constant dense<0xFF800000> : vector<256xf32>
    %23 = vector.multi_reduction <maximumf>, %22, %cst_13 [1] : vector<256x128xf32> to vector<256xf32>
    %24 = vector.shape_cast %23 : vector<256xf32> to vector<256x1xf32>
    %25 = vector.broadcast %24 : vector<256x1xf32> to vector<256x128xf32>
    %26 = arith.subf %22, %25 : vector<256x128xf32>
    %27 = math.exp %26 : vector<256x128xf32>
    %cst_14 = arith.constant dense<0.000000e+00> : vector<256xf32>
    %28 = vector.multi_reduction <add>, %27, %cst_14 [1] : vector<256x128xf32> to vector<256xf32>
    %29 = vector.shape_cast %28 : vector<256xf32> to vector<256x1xf32>
    %30 = vector.broadcast %29 : vector<256x1xf32> to vector<256x128xf32>
    %31 = arith.divf %27, %30 : vector<256x128xf32>
    %c0_15 = arith.constant 0 : index
    %c0_16 = arith.constant 0 : index
    %32 = vector.load %arg4[%c0_15, %c0_16] : memref<256x128xf32, #tpu.memory_space<vmem>>, vector<256x128xf32>
    tpu.vector_store %arg4[%c0_15, %c0_16], %31 {strides = array<i32>} : memref<256x128xf32, #tpu.memory_space<vmem>>, vector<256x128xf32>,
    return
  }
  func.func @transform_0(%arg0: i32) -> (i32, i32) {
    %c0_i32 = arith.constant 0 : i32
    %c0_i32_0 = arith.constant 0 : i32
    return %arg0, %c0_i32 : i32, i32
  }
  func.func @transform_1(%arg0: i32) -> (i32, i32) {
    %c0_i32 = arith.constant 0 : i32
    %c0_i32_0 = arith.constant 0 : i32
    %c0_i32_1 = arith.constant 0 : i32
    return %c0_i32, %c0_i32_0 : i32, i32
  }
  func.func @transform_2(%arg0: i32) -> (i32, i32) {
    %c0_i32 = arith.constant 0 : i32
    %c0_i32_0 = arith.constant 0 : i32
    %c0_i32_1 = arith.constant 0 : i32
    return %c0_i32, %c0_i32_0 : i32, i32
  }
  func.func @transform_3(%arg0: i32) -> (i32, i32) {
    %c0_i32 = arith.constant 0 : i32
    %c0_i32_0 = arith.constant 0 : i32
    return %arg0, %c0_i32 : i32, i32
  }
}

</mosaic_0001>

<bundles_post_ra>
// kernel: dnn_arch_forward.1
= control target key start
LH: loop header
LB: loop body
LE: loop exit
PB: predicated region body
PF: predicated region fallthrough
CT: control target
= control target key end

     0   :  { %vm107_vm0 = vcmask 130048   ;;  %s2294_s1 = inlined_call_operand.vmem [shape: bf16[272,128], index: 1, kind: input, shape index: {}]   ;;  %s2295_s0 = inlined_call_operand.vmem [shape: f32[256,16], index: 0, kind: input, shape index: {}]   ;;  %s2296_s2 = inlined_call_operand.vmem [shape: f32[3,128], index: 2, kind: input, shape index: {}]   ;;  %s2297_s3 = inlined_call_operand.vmem [shape: f32[256,128], index: 3, kind: output, shape index: {}]  }
   0x1   :  { %v1441_v0 = vld [vmem:[%s2294_s1] sm:$0xff]  ;;  %v16_v2 = vld [vmem:[%s2295_s0 + $0x8] sm:$0xff]  ;;  %v17_v4 = vld [vmem:[%s2295_s0 + $0x10] sm:$0xff] }
   0x2   :  { %v15_v1 = vld [vmem:[%s2295_s0] sm:$0xff]  ;;  %163 = vmatpush.bf16.msra.mxu0 %v1441_v0  ;;  %1458 = vmatpush.bf16.msra.mxu3 %v1441_v0  ;;  %v18_v5 = vld [vmem:[%s2295_s0 + $0x18] sm:$0xff]  ;;  %v20_v8 = vld [vmem:[%s2295_s0 + $0x28] sm:$0xff] }
   0x3   :  { %v47_v3 = vpack.c.bf16 %v16_v2, %v15_v1  ;;  %v48_v6 = vpack.c.bf16 %v18_v5, %v17_v4  ;;  %v19_v7 = vld [vmem:[%s2295_s0 + $0x20] sm:$0xff]  ;;  %v21_v10 = vld [vmem:[%s2295_s0 + $0x30] sm:$0xff]  ;;  %v22_v11 = vld [vmem:[%s2295_s0 + $0x38] sm:$0xff] }
   0x4   :  { %v49_v9 = vpack.c.bf16 %v20_v8, %v19_v7  ;;  %v50_v12 = vpack.c.bf16 %v22_v11, %v21_v10  ;;  %v23_v13 = vld [vmem:[%s2295_s0 + $0x40] sm:$0xff]  ;;  %v24_v14 = vld [vmem:[%s2295_s0 + $0x48] sm:$0xff]  ;;  %v25_v17 = vld [vmem:[%s2295_s0 + $0x50] sm:$0xff] }
   0x5   :  { %1361 = vmatmul.msk.bf16.vlgmr.msra.gmra.mxu0 %vm107_vm0, %v47_v3  ;;  %v51_v15 = vpack.c.bf16 %v24_v14, %v23_v13  ;;  %v1449_v16 = vld [vmem:[%s2294_s1 + $0x40] sm:$0xff]  ;;  %v26_v18 = vld [vmem:[%s2295_s0 + $0x58] sm:$0xff]  ;;  %v1447_v21 = vld [vmem:[%s2294_s1 + $0x30] sm:$0xff] }
   0x6   :  { %342 = vmatpush.bf16.msra.mxu1 %v1449_v16  ;;  %1459 = vmatpush.bf16.msrb.mxu3 %v1449_v16  ;;  %v52_v19 = vpack.c.bf16 %v26_v18, %v25_v17  ;;  %v1448_v20 = vld [vmem:[%s2294_s1 + $0x38] sm:$0xff]  ;;  %v1446_v22 = vld [vmem:[%s2294_s1 + $0x28] sm:$0xff]  ;;  %v27_v23 = vld [vmem:[%s2295_s0 + $0x60] sm:$0xff] }
   0x7   :  { %v28_v24 = vld [vmem:[%s2295_s0 + $0x68] sm:$0xff]  ;;  %v1445_v25 = vld [vmem:[%s2294_s1 + $0x20] sm:$0xff]  ;;  %v1444_v27 = vld [vmem:[%s2294_s1 + $0x18] sm:$0xff] }
   0x8   :  { %v53_v26 = vpack.c.bf16 %v28_v24, %v27_v23  ;;  %v1443_v28 = vld [vmem:[%s2294_s1 + $0x10] sm:$0xff]  ;;  %v1442_v29 = vld [vmem:[%s2294_s1 + $0x8] sm:$0xff]  ;;  %v30_v31 = vld [vmem:[%s2295_s0 + $0x78] sm:$0xff] }
   0x9   :  { %v29_v30 = vld [vmem:[%s2295_s0 + $0x70] sm:$0xff]  ;;  %v31_v33 = vld [vmem:[%s2295_s0 + $0x80] sm:$0xff]  ;;  %v32_v34 = vld [vmem:[%s2295_s0 + $0x88] sm:$0xff] }
   0xa   :  { %343 = vmatpush.bf16.msra.mxu1 %v1448_v20  ;;  %1460 = vmatpush.bf16.msrb.mxu3 %v1448_v20  ;;  %v54_v32 = vpack.c.bf16 %v30_v31, %v29_v30  ;;  %v55_v35 = vpack.c.bf16 %v32_v34, %v31_v33  ;;  %v1718_v37 = vld [vmem:[%s2296_s2] ss:$0 sm:$0xff]  ;;  %v33_v43 = vld [vmem:[%s2295_s0 + $0x90] sm:$0xff]  ;;  %v34_v44 = vld [vmem:[%s2295_s0 + $0x98] sm:$0xff] }
   0xb   :  { %v56_v46 = vpack.c.bf16 %v34_v44, %v33_v43  ;;  %v35_v53 = vld [vmem:[%s2295_s0 + $0xa0] sm:$0xff]  ;;  %v36_v54 = vld [vmem:[%s2295_s0 + $0xa8] sm:$0xff]  ;;  %v41_v58 = vld [vmem:[%s2295_s0 + $0xd0] sm:$0xff] }
   0xc   :  { %v57_v56 = vpack.c.bf16 %v36_v54, %v35_v53  ;;  %v42_v59 = vld [vmem:[%s2295_s0 + $0xd8] sm:$0xff]  ;;  %v37_v2 = vld [vmem:[%s2295_s0 + $0xb0] sm:$0xff]  ;;  %v43_v7 = vld [vmem:[%s2295_s0 + $0xe0] sm:$0xff] }
   0xd   :  { %v60_v60 = vpack.c.bf16 %v42_v59, %v41_v58  ;;  %v38_v3 = vld [vmem:[%s2295_s0 + $0xb8] sm:$0xff]  ;;  %v44_v8 = vld [vmem:[%s2295_s0 + $0xe8] sm:$0xff]  ;;  %v45_v20 = vld [vmem:[%s2295_s0 + $0xf0] sm:$0xff] }
   0xe   :  { %344 = vmatpush.bf16.msra.mxu1 %v1447_v21  ;;  %1461 = vmatpush.bf16.msrb.mxu3 %v1447_v21  ;;  %v58_v5 = vpack.c.bf16 %v38_v3, %v37_v2  ;;  %v40_v16 = vld [vmem:[%s2295_s0 + $0xc8] sm:$0xff]  ;;  %v46_v21 = vld [vmem:[%s2295_s0 + $0xf8] sm:$0xff]  ;;  %v1457_v33 = vld [vmem:[%s2294_s1 + $0x80] sm:$0xff] }
   0xf   :  { %1374 = vmatmul.msk.bf16.vlgmr.msra.gmra.mxu3 %vm107_vm0, %v60_v60  ;;  %528 = vmatpush.bf16.msra.mxu2 %v1457_v33  ;;  %v1815_v3 = vld [vmem:[%s2296_s2 + $0x1] ss:$0 sm:$0xff] }
  0x12   :  { %345 = vmatpush.bf16.msra.mxu1 %v1446_v22  ;;  %1462 = vmatpush.bf16.msrb.mxu3 %v1446_v22  ;;  %v62_v22 = vpack.c.bf16 %v46_v21, %v45_v20 }
  0x15   :  { %1362 = vmatmul.msk.bf16.gmra.mxu0 %vm107_vm0, %v48_v6 }
  0x16   :  { %346 = vmatpush.bf16.msra.mxu1 %v1445_v25  ;;  %1463 = vmatpush.bf16.msrb.mxu3 %v1445_v25 }
  0x1a   :  { %347 = vmatpush.bf16.msra.mxu1 %v1444_v27  ;;  %1464 = vmatpush.bf16.msrb.mxu3 %v1444_v27 }
  0x1e   :  { %348 = vmatpush.bf16.msra.mxu1 %v1443_v28  ;;  %1465 = vmatpush.bf16.msrb.mxu3 %v1443_v28 }
  0x22   :  { %349 = vmatpush.bf16.msra.mxu1 %v1442_v29  ;;  %1466 = vmatpush.bf16.msrb.mxu3 %v1442_v29 }
  0x25   :  { %1363 = vmatmul.msk.bf16.gmra.mxu0 %vm107_vm0, %v49_v9  ;;  %v61_v9 = vpack.c.bf16 %v44_v8, %v43_v7 }
  0x26   :  { %1467 = vmatpush.bf16.msra.mxu3 %v1457_v33 }
  0x27   :  { %1375 = vmatmul.msk.bf16.gmra.mxu3 %vm107_vm0, %v61_v9 }
  0x35   :  { %1364 = vmatmul.msk.bf16.gmra.mxu0 %vm107_vm0, %v50_v12 }
  0x37   :  { %1376 = vmatmul.msk.bf16.gmra.mxu3 %vm107_vm0, %v62_v22 }
  0x45   :  { %1365 = vmatmul.msk.bf16.gmra.mxu0 %vm107_vm0, %v51_v15  ;;  %v39_v15 = vld [vmem:[%s2295_s0 + $0xc0] sm:$0xff] }
  0x46   :  { %v59_v18 = vpack.c.bf16 %v40_v16, %v39_v15 }
  0x55   :  { %1366 = vmatmul.msk.bf16.gmra.mxu0 %vm107_vm0, %v52_v19 }
  0x65   :  { %1367 = vmatmul.msk.bf16.gmra.mxu0 %vm107_vm0, %v53_v26 }
  0x75   :  { %1368 = vmatmul.msk.bf16.gmra.mxu0 %vm107_vm0, %v54_v32 }
  0x82   :  { %v165_v36 = vpop.f32.mrf.mxu0 }
  0x83   :  { %v166_v38 = vadd.f32 %v1718_v37, %v165_v36 }
  0x85   :  { %1369 = vmatmul.msk.bf16.gmra.mxu0 %vm107_vm0, %v55_v35  ;;  %v245_v41 = vmax.f32 %v166_v38, 0.0  ;;  %v1456_v38 = vld [vmem:[%s2294_s1 + $0x78] sm:$0xff] }
  0x86   :  { %529 = vmatpush.bf16.msra.mxu2 %v1456_v38  ;;  %1468 = vmatpush.bf16.msra.mxu3 %v1456_v38 }
  0x8a   :  { %v167_v39 = vpop.f32.mrf.mxu0 }
  0x8b   :  { %v168_v40 = vadd.f32 %v1718_v37, %v167_v39 }
  0x8d   :  { %v246_v42 = vmax.f32 %v168_v40, 0.0  ;;  %v1455_v40 = vld [vmem:[%s2294_s1 + $0x70] sm:$0xff] }
  0x8e   :  { %530 = vmatpush.bf16.msra.mxu2 %v1455_v40  ;;  %1469 = vmatpush.bf16.msra.mxu3 %v1455_v40 }
  0x8f   :  { %v277_v45 = vpack.c.bf16 %v246_v42, %v245_v41  ;;  %v1454_v41 = vld [vmem:[%s2294_s1 + $0x68] sm:$0xff] }
  0x91   :  { %350 = vmatmul.bf16.vlgmr.msra.gmra.mxu1 %v277_v45  ;;  %v1453_v45 = vld [vmem:[%s2294_s1 + $0x60] sm:$0xff] }
  0x92   :  { %v170_v47 = vpop.f32.mrf.mxu0  ;;  %531 = vmatpush.bf16.msra.mxu2 %v1454_v41  ;;  %1470 = vmatpush.bf16.msra.mxu3 %v1454_v41 }
  0x93   :  { %v171_v48 = vadd.f32 %v1718_v37, %v170_v47 }
  0x95   :  { %1370 = vmatmul.msk.bf16.gmra.mxu0 %vm107_vm0, %v56_v46  ;;  %v247_v51 = vmax.f32 %v171_v48, 0.0 }
  0x96   :  { %532 = vmatpush.bf16.msra.mxu2 %v1453_v45  ;;  %1471 = vmatpush.bf16.msra.mxu3 %v1453_v45 }
  0x9a   :  { %v172_v49 = vpop.f32.mrf.mxu0 }
  0x9b   :  { %v173_v50 = vadd.f32 %v1718_v37, %v172_v49  ;;  %v1452_v49 = vld [vmem:[%s2294_s1 + $0x58] sm:$0xff] }
  0x9c   :  { %533 = vmatpush.bf16.msra.mxu2 %v1452_v49  ;;  %1472 = vmatpush.bf16.msra.mxu3 %v1452_v49 }
  0x9d   :  { %v248_v52 = vmax.f32 %v173_v50, 0.0 }
  0x9f   :  { %v278_v55 = vpack.c.bf16 %v248_v52, %v247_v51  ;;  %v1451_v51 = vld [vmem:[%s2294_s1 + $0x50] sm:$0xff]  ;;  %v1450_v52 = vld [vmem:[%s2294_s1 + $0x48] sm:$0xff] }
  0xa0   :  { %534 = vmatpush.bf16.msra.mxu2 %v1451_v51  ;;  %1473 = vmatpush.bf16.msra.mxu3 %v1451_v51 }
  0xa1   :  { %355 = vmatmul.bf16.gmra.mxu1 %v278_v55 }
  0xa2   :  { %v175_v57 = vpop.f32.mrf.mxu0 }
  0xa3   :  { %v176_v61 = vadd.f32 %v1718_v37, %v175_v57 }
  0xa4   :  { %535 = vmatpush.bf16.msra.mxu2 %v1450_v52  ;;  %1474 = vmatpush.bf16.msra.mxu3 %v1450_v52 }
  0xa5   :  { %1371 = vmatmul.msk.bf16.gmra.mxu0 %vm107_vm0, %v57_v56  ;;  %v249_v0 = vmax.f32 %v176_v61, 0.0 }
  0xaa   :  { %v177_v62 = vpop.f32.mrf.mxu0 }
  0xab   :  { %v178_v63 = vadd.f32 %v1718_v37, %v177_v62 }
  0xad   :  { %v250_v1 = vmax.f32 %v178_v63, 0.0 }
  0xaf   :  { %v279_v4 = vpack.c.bf16 %v250_v1, %v249_v0 }
  0xb1   :  { %360 = vmatmul.bf16.gmra.mxu1 %v279_v4 }
  0xb2   :  { %v180_v6 = vpop.f32.mrf.mxu0 }
  0xb3   :  { %v181_v10 = vadd.f32 %v1718_v37, %v180_v6 }
  0xb5   :  { %1372 = vmatmul.msk.bf16.gmra.mxu0 %vm107_vm0, %v58_v5  ;;  %v251_v13 = vmax.f32 %v181_v10, 0.0 }
  0xba   :  { %v182_v11 = vpop.f32.mrf.mxu0 }
  0xbb   :  { %v183_v12 = vadd.f32 %v1718_v37, %v182_v11 }
  0xbd   :  { %v252_v14 = vmax.f32 %v183_v12, 0.0 }
  0xbf   :  { %v280_v17 = vpack.c.bf16 %v252_v14, %v251_v13 }
  0xc1   :  { %365 = vmatmul.bf16.gmra.mxu1 %v280_v17 }
  0xc2   :  { %v185_v19 = vpop.f32.mrf.mxu0 }
  0xc3   :  { %v186_v23 = vadd.f32 %v1718_v37, %v185_v19 }
  0xc5   :  { %1373 = vmatmul.msk.bf16.gmra.mxu0 %vm107_vm0, %v59_v18  ;;  %v253_v26 = vmax.f32 %v186_v23, 0.0 }
  0xca   :  { %v187_v24 = vpop.f32.mrf.mxu0 }
  0xcb   :  { %v188_v25 = vadd.f32 %v1718_v37, %v187_v24 }
  0xcd   :  { %v254_v27 = vmax.f32 %v188_v25, 0.0 }
  0xcf   :  { %v281_v28 = vpack.c.bf16 %v254_v27, %v253_v26 }
  0xd1   :  { %370 = vmatmul.bf16.gmra.mxu1 %v281_v28 }
  0xd2   :  { %v190_v29 = vpop.f32.mrf.mxu0 }
  0xd3   :  { %v191_v30 = vadd.f32 %v1718_v37, %v190_v29 }
  0xd5   :  { %v255_v34 = vmax.f32 %v191_v30, 0.0 }
  0xda   :  { %v192_v31 = vpop.f32.mrf.mxu0 }
  0xdb   :  { %v193_v32 = vadd.f32 %v1718_v37, %v192_v31 }
  0xdd   :  { %v256_v35 = vmax.f32 %v193_v32, 0.0 }
  0xdf   :  { %v282_v36 = vpack.c.bf16 %v256_v35, %v255_v34 }
  0xe1   :  { %375 = vmatmul.bf16.gmra.mxu1 %v282_v36 }
  0xe2   :  { %v195_v39 = vpop.f32.mrf.mxu0 }
  0xe3   :  { %v196_v42 = vadd.f32 %v1718_v37, %v195_v39 }
  0xe5   :  { %v257_v46 = vmax.f32 %v196_v42, 0.0 }
  0xea   :  { %v197_v43 = vpop.f32.mrf.mxu0 }
  0xeb   :  { %v198_v44 = vadd.f32 %v1718_v37, %v197_v43 }
  0xed   :  { %v258_v47 = vmax.f32 %v198_v44, 0.0 }
  0xef   :  { %v283_v48 = vpack.c.bf16 %v258_v47, %v257_v46 }
  0xf1   :  { %380 = vmatmul.bf16.gmra.mxu1 %v283_v48  ;;  %v230_v48 = vpop.f32.mrf.mxu3 }
  0xf2   :  { %v200_v50 = vpop.f32.mrf.mxu0 }
  0xf3   :  { %v201_v53 = vadd.f32 %v1718_v37, %v200_v50 }
  0xf5   :  { %v259_v56 = vmax.f32 %v201_v53, 0.0 }
  0xfa   :  { %v202_v54 = vpop.f32.mrf.mxu0 }
  0xfb   :  { %v203_v55 = vadd.f32 %v1718_v37, %v202_v54 }
  0xfd   :  { %v260_v57 = vmax.f32 %v203_v55, 0.0 }
  0xff   :  { %v284_v58 = vpack.c.bf16 %v260_v57, %v259_v56 }
 0x101   :  { %385 = vmatmul.bf16.gmra.mxu1 %v284_v58  ;;  %v232_v58 = vpop.f32.mrf.mxu3 }
 0x102   :  { %v205_v59 = vpop.f32.mrf.mxu0 }
 0x103   :  { %v206_v60 = vadd.f32 %v1718_v37, %v205_v59 }
 0x105   :  { %v261_v63 = vmax.f32 %v206_v60, 0.0 }
 0x10a   :  { %v207_v61 = vpop.f32.mrf.mxu0 }
 0x10b   :  { %v208_v62 = vadd.f32 %v1718_v37, %v207_v61 }
 0x10d   :  { %v262_v0 = vmax.f32 %v208_v62, 0.0 }
 0x10e   :  { %v351_v1 = vpop.f32.mrf.mxu1 }
 0x10f   :  { %v285_v2 = vpack.c.bf16 %v262_v0, %v261_v63  ;;  %v352_v5 = vadd.f32 %v1815_v3, %v351_v1  ;;  %v235_v1 = vpop.f32.mrf.mxu3 }
 0x111   :  { %390 = vmatmul.bf16.gmra.mxu1 %v285_v2  ;;  %v431_v8 = vmax.f32 %v352_v5, 0.0  ;;  %v231_v2 = vadd.f32 %v1718_v37, %v230_v48 }
 0x112   :  { %v210_v4 = vpop.f32.mrf.mxu0 }
 0x113   :  { %v211_v9 = vadd.f32 %v1718_v37, %v210_v4  ;;  %v233_v4 = vadd.f32 %v1718_v37, %v232_v58 }
 0x115   :  { %v263_v14 = vmax.f32 %v211_v9, 0.0  ;;  %v272_v9 = vmax.f32 %v233_v4, 0.0 }
 0x116   :  { %v353_v6 = vpop.f32.mrf.mxu1 }
 0x117   :  { %v354_v7 = vadd.f32 %v1815_v3, %v353_v6 }
 0x119   :  { %v432_v10 = vmax.f32 %v354_v7, 0.0 }
 0x11a   :  { %v212_v11 = vpop.f32.mrf.mxu0 }
 0x11b   :  { %v213_v12 = vadd.f32 %v1718_v37, %v212_v11  ;;  %v463_v13 = vpack.c.bf16 %v432_v10, %v431_v8  ;;  %v271_v8 = vmax.f32 %v231_v2, 0.0 }
 0x11d   :  { %v264_v15 = vmax.f32 %v213_v12, 0.0  ;;  %536 = vmatmul.bf16.vlgmr.msra.gmra.mxu2 %v463_v13  ;;  %v290_v12 = vpack.c.bf16 %v272_v9, %v271_v8  ;;  %v237_v13 = vpop.f32.mrf.mxu3 }
 0x11e   :  { %v356_v16 = vpop.f32.mrf.mxu1 }
 0x11f   :  { %v286_v17 = vpack.c.bf16 %v264_v15, %v263_v14  ;;  %v357_v19 = vadd.f32 %v1815_v3, %v356_v16  ;;  %v236_v16 = vadd.f32 %v1718_v37, %v235_v1 }
 0x121   :  { %395 = vmatmul.bf16.gmra.mxu1 %v286_v17  ;;  %v433_v22 = vmax.f32 %v357_v19, 0.0  ;;  %v238_v17 = vadd.f32 %v1718_v37, %v237_v13 }
 0x122   :  { %v215_v18 = vpop.f32.mrf.mxu0 }
 0x123   :  { %v216_v23 = vadd.f32 %v1718_v37, %v215_v18 }
 0x125   :  { %v265_v28 = vmax.f32 %v216_v23, 0.0  ;;  %v274_v23 = vmax.f32 %v238_v17, 0.0 }
 0x126   :  { %v358_v20 = vpop.f32.mrf.mxu1 }
 0x127   :  { %v359_v21 = vadd.f32 %v1815_v3, %v358_v20 }
 0x129   :  { %v434_v24 = vmax.f32 %v359_v21, 0.0  ;;  %v240_v21 = vpop.f32.mrf.mxu3 }
 0x12a   :  { %v217_v25 = vpop.f32.mrf.mxu0 }
 0x12b   :  { %v218_v26 = vadd.f32 %v1718_v37, %v217_v25  ;;  %v464_v27 = vpack.c.bf16 %v434_v24, %v433_v22  ;;  %v273_v22 = vmax.f32 %v236_v16, 0.0 }
 0x12d   :  { %v266_v29 = vmax.f32 %v218_v26, 0.0  ;;  %541 = vmatmul.bf16.gmra.mxu2 %v464_v27  ;;  %v291_v26 = vpack.c.bf16 %v274_v23, %v273_v22 }
 0x12e   :  { %v361_v30 = vpop.f32.mrf.mxu1 }
 0x12f   :  { %v287_v31 = vpack.c.bf16 %v266_v29, %v265_v28  ;;  %v362_v33 = vadd.f32 %v1815_v3, %v361_v30  ;;  %v241_v30 = vadd.f32 %v1718_v37, %v240_v21 }
 0x131   :  { %400 = vmatmul.bf16.gmra.mxu1 %v287_v31  ;;  %v435_v36 = vmax.f32 %v362_v33, 0.0  ;;  %v242_v27 = vpop.f32.mrf.mxu3 }
 0x132   :  { %v220_v32 = vpop.f32.mrf.mxu0  ;;  %v243_v31 = vadd.f32 %v1718_v37, %v242_v27 }
 0x133   :  { %v221_v38 = vadd.f32 %v1718_v37, %v220_v32 }
 0x135   :  { %v267_v43 = vmax.f32 %v221_v38, 0.0 }
 0x136   :  { %v363_v34 = vpop.f32.mrf.mxu1 }
 0x137   :  { %v364_v35 = vadd.f32 %v1815_v3, %v363_v34 }
 0x139   :  { %v436_v39 = vmax.f32 %v364_v35, 0.0  ;;  %v275_v35 = vmax.f32 %v241_v30, 0.0 }
 0x13a   :  { %v222_v40 = vpop.f32.mrf.mxu0 }
 0x13b   :  { %v223_v41 = vadd.f32 %v1718_v37, %v222_v40  ;;  %v465_v42 = vpack.c.bf16 %v436_v39, %v435_v36  ;;  %v276_v36 = vmax.f32 %v243_v31, 0.0 }
 0x13d   :  { %v268_v44 = vmax.f32 %v223_v41, 0.0  ;;  %546 = vmatmul.bf16.gmra.mxu2 %v465_v42  ;;  %v292_v40 = vpack.c.bf16 %v276_v36, %v275_v35 }
 0x13e   :  { %v366_v45 = vpop.f32.mrf.mxu1 }
 0x13f   :  { %v288_v46 = vpack.c.bf16 %v268_v44, %v267_v43  ;;  %v367_v49 = vadd.f32 %v1815_v3, %v366_v45 }
 0x141   :  { %405 = vmatmul.bf16.gmra.mxu1 %v288_v46  ;;  %v437_v52 = vmax.f32 %v367_v49, 0.0 }
 0x142   :  { %v225_v47 = vpop.f32.mrf.mxu0 }
 0x143   :  { %v226_v53 = vadd.f32 %v1718_v37, %v225_v47 }
 0x145   :  { %v269_v59 = vmax.f32 %v226_v53, 0.0  ;;  %v1852_v53 = vld [vmem:[%s2296_s2 + $0x2] ss:$0 sm:$0xff] }
 0x146   :  { %v368_v50 = vpop.f32.mrf.mxu1 }
 0x147   :  { %v369_v51 = vadd.f32 %v1815_v3, %v368_v50 }
 0x149   :  { %v438_v54 = vmax.f32 %v369_v51, 0.0 }
 0x14a   :  { %v227_v55 = vpop.f32.mrf.mxu0 }
 0x14b   :  { %v228_v56 = vadd.f32 %v1718_v37, %v227_v55  ;;  %v466_v57 = vpack.c.bf16 %v438_v54, %v437_v52 }
 0x14d   :  { %v270_v60 = vmax.f32 %v228_v56, 0.0  ;;  %551 = vmatmul.bf16.gmra.mxu2 %v466_v57 }
 0x14e   :  { %v371_v61 = vpop.f32.mrf.mxu1 }
 0x14f   :  { %v289_v62 = vpack.c.bf16 %v270_v60, %v269_v59  ;;  %v372_v63 = vadd.f32 %v1815_v3, %v371_v61 }
 0x151   :  { %410 = vmatmul.bf16.vlgmr.msrb.gmra.mxu3 %v289_v62  ;;  %v439_v6 = vmax.f32 %v372_v63, 0.0 }
 0x156   :  { %v373_v0 = vpop.f32.mrf.mxu1 }
 0x157   :  { %v374_v5 = vadd.f32 %v1815_v3, %v373_v0 }
 0x159   :  { %v440_v7 = vmax.f32 %v374_v5, 0.0 }
 0x15b   :  { %v467_v10 = vpack.c.bf16 %v440_v7, %v439_v6 }
 0x15d   :  { %556 = vmatmul.bf16.gmra.mxu2 %v467_v10 }
 0x15e   :  { %v376_v11 = vpop.f32.mrf.mxu1 }
 0x15f   :  { %v377_v14 = vadd.f32 %v1815_v3, %v376_v11 }
 0x161   :  { %415 = vmatmul.bf16.gmra.mxu3 %v290_v12  ;;  %v441_v19 = vmax.f32 %v377_v14, 0.0 }
 0x166   :  { %v378_v15 = vpop.f32.mrf.mxu1 }
 0x167   :  { %v379_v18 = vadd.f32 %v1815_v3, %v378_v15 }
 0x169   :  { %v442_v20 = vmax.f32 %v379_v18, 0.0 }
 0x16b   :  { %v468_v24 = vpack.c.bf16 %v442_v20, %v441_v19 }
 0x16d   :  { %561 = vmatmul.bf16.gmra.mxu2 %v468_v24 }
 0x16e   :  { %v381_v25 = vpop.f32.mrf.mxu1 }
 0x16f   :  { %v382_v28 = vadd.f32 %v1815_v3, %v381_v25 }
 0x171   :  { %420 = vmatmul.bf16.gmra.mxu3 %v291_v26  ;;  %v443_v33 = vmax.f32 %v382_v28, 0.0 }
 0x176   :  { %v383_v29 = vpop.f32.mrf.mxu1 }
 0x177   :  { %v384_v32 = vadd.f32 %v1815_v3, %v383_v29 }
 0x179   :  { %v444_v34 = vmax.f32 %v384_v32, 0.0 }
 0x17b   :  { %v469_v38 = vpack.c.bf16 %v444_v34, %v443_v33 }
 0x17d   :  { %566 = vmatmul.bf16.gmra.mxu2 %v469_v38 }
 0x17e   :  { %v386_v39 = vpop.f32.mrf.mxu1 }
 0x17f   :  { %v387_v41 = vadd.f32 %v1815_v3, %v386_v39 }
 0x181   :  { %425 = vmatmul.bf16.gmra.mxu3 %v292_v40  ;;  %v445_v44 = vmax.f32 %v387_v41, 0.0 }
 0x186   :  { %v388_v42 = vpop.f32.mrf.mxu1 }
 0x187   :  { %v389_v43 = vadd.f32 %v1815_v3, %v388_v42 }
 0x189   :  { %v446_v45 = vmax.f32 %v389_v43, 0.0 }
 0x18b   :  { %v470_v46 = vpack.c.bf16 %v446_v45, %v445_v44 }
 0x18d   :  { %571 = vmatmul.bf16.gmra.mxu2 %v470_v46 }
 0x18e   :  { %v391_v37 = vpop.f32.mrf.mxu1 }
 0x18f   :  { %v392_v47 = vadd.f32 %v1815_v3, %v391_v37 }
 0x191   :  { %v447_v50 = vmax.f32 %v392_v47, 0.0 }
 0x196   :  { %v393_v48 = vpop.f32.mrf.mxu1 }
 0x197   :  { %v394_v49 = vadd.f32 %v1815_v3, %v393_v48 }
 0x199   :  { %v448_v51 = vmax.f32 %v394_v49, 0.0 }
 0x19b   :  { %v471_v52 = vpack.c.bf16 %v448_v51, %v447_v50 }
 0x19d   :  { %576 = vmatmul.bf16.gmra.mxu2 %v471_v52 }
 0x19e   :  { %v396_v54 = vpop.f32.mrf.mxu1 }
 0x19f   :  { %v397_v57 = vadd.f32 %v1815_v3, %v396_v54 }
 0x1a0   :  { %v537_v55 = vpop.f32.mrf.mxu2 }
 0x1a1   :  { %v1855_v56 = vadd.f32 %v1852_v53, %v537_v55  ;;  %v449_v61 = vmax.f32 %v397_v57, 0.0 }
 0x1a3   :  { %617 = vmax.xlane.f32.xlu0 %v1855_v56 }
 0x1a6   :  { %v398_v58 = vpop.f32.mrf.mxu1 }
 0x1a7   :  { %v399_v59 = vadd.f32 %v1815_v3, %v398_v58 }
 0x1a8   :  { %v539_v60 = vpop.f32.mrf.mxu2 }
 0x1a9   :  { %v450_v62 = vmax.f32 %v399_v59, 0.0  ;;  %v1861_v63 = vadd.f32 %v1852_v53, %v539_v60 }
 0x1ab   :  { %619 = vmax.xlane.f32.xlu0 %v1861_v63  ;;  %v472_v0 = vpack.c.bf16 %v450_v62, %v449_v61 }
 0x1ad   :  { %581 = vmatmul.bf16.gmra.mxu2 %v472_v0 }
 0x1ae   :  { %v401_v1 = vpop.f32.mrf.mxu1 }
 0x1af   :  { %v402_v5 = vadd.f32 %v1815_v3, %v401_v1 }
 0x1b0   :  { %v542_v2 = vpop.f32.mrf.mxu2 }
 0x1b1   :  { %v1865_v4 = vadd.f32 %v1852_v53, %v542_v2  ;;  %v451_v9 = vmax.f32 %v402_v5, 0.0 }
 0x1b3   :  { %621 = vmax.xlane.f32.xlu1 %v1865_v4 }
 0x1b6   :  { %v403_v6 = vpop.f32.mrf.mxu1 }
 0x1b7   :  { %v404_v7 = vadd.f32 %v1815_v3, %v403_v6 }
 0x1b8   :  { %v544_v8 = vpop.f32.mrf.mxu2 }
 0x1b9   :  { %v452_v10 = vmax.f32 %v404_v7, 0.0  ;;  %v1871_v11 = vadd.f32 %v1852_v53, %v544_v8 }
 0x1bb   :  { %623 = vmax.xlane.f32.xlu1 %v1871_v11  ;;  %v473_v12 = vpack.c.bf16 %v452_v10, %v451_v9 }
 0x1bd   :  { %586 = vmatmul.bf16.gmra.mxu2 %v473_v12 }
 0x1be   :  { %v406_v13 = vpop.f32.mrf.mxu1 }
 0x1bf   :  { %v407_v16 = vadd.f32 %v1815_v3, %v406_v13 }
 0x1c0   :  { %v547_v14 = vpop.f32.mrf.mxu2 }
 0x1c1   :  { %v1875_v15 = vadd.f32 %v1852_v53, %v547_v14  ;;  %v453_v20 = vmax.f32 %v407_v16, 0.0 }
 0x1c3   :  { %625 = vmax.xlane.f32.xlu2 %v1875_v15 }
 0x1c6   :  { %v408_v17 = vpop.f32.mrf.mxu1 }
 0x1c7   :  { %v409_v18 = vadd.f32 %v1815_v3, %v408_v17 }
 0x1c8   :  { %v549_v19 = vpop.f32.mrf.mxu2 }
 0x1c9   :  { %v454_v21 = vmax.f32 %v409_v18, 0.0  ;;  %v1881_v22 = vadd.f32 %v1852_v53, %v549_v19 }
 0x1cb   :  { %627 = vmax.xlane.f32.xlu2 %v1881_v22  ;;  %v474_v23 = vpack.c.bf16 %v454_v21, %v453_v20 }
 0x1cd   :  { %591 = vmatmul.bf16.gmra.mxu2 %v474_v23 }
 0x1d0   :  { %v552_v24 = vpop.f32.mrf.mxu2 }
 0x1d1   :  { %v1885_v25 = vadd.f32 %v1852_v53, %v552_v24 }
 0x1d3   :  { %629 = vmax.xlane.f32.xlu0 %v1885_v25 }
 0x1d4   :  { %v411_v26 = vpop.f32.mrf.mxu3 }
 0x1d5   :  { %v412_v29 = vadd.f32 %v1815_v3, %v411_v26 }
 0x1d7   :  { %v455_v32 = vmax.f32 %v412_v29, 0.0 }
 0x1d8   :  { %v554_v27 = vpop.f32.mrf.mxu2 }
 0x1d9   :  { %v1889_v28 = vadd.f32 %v1852_v53, %v554_v27 }
 0x1db   :  { %631 = vmax.xlane.f32.xlu1 %v1889_v28 }
 0x1dc   :  { %v413_v30 = vpop.f32.mrf.mxu3 }
 0x1dd   :  { %v414_v31 = vadd.f32 %v1815_v3, %v413_v30 }
 0x1df   :  { %v456_v33 = vmax.f32 %v414_v31, 0.0 }
 0x1e0   :  { %v557_v34 = vpop.f32.mrf.mxu2 }
 0x1e1   :  { %v475_v35 = vpack.c.bf16 %v456_v33, %v455_v32  ;;  %v1895_v36 = vadd.f32 %v1852_v53, %v557_v34 }
 0x1e3   :  { %596 = vmatmul.bf16.vlgmr.msra.gmra.mxu3 %v475_v35  ;;  %633 = vmax.xlane.f32.xlu2 %v1895_v36 }
 0x1e4   :  { %v416_v38 = vpop.f32.mrf.mxu3 }
 0x1e5   :  { %v417_v41 = vadd.f32 %v1815_v3, %v416_v38 }
 0x1e7   :  { %v457_v44 = vmax.f32 %v417_v41, 0.0 }
 0x1e8   :  { %v559_v39 = vpop.f32.mrf.mxu2 }
 0x1e9   :  { %v1899_v40 = vadd.f32 %v1852_v53, %v559_v39 }
 0x1eb   :  { %635 = vmax.xlane.f32.xlu0 %v1899_v40 }
 0x1ec   :  { %v418_v42 = vpop.f32.mrf.mxu3 }
 0x1ed   :  { %v419_v43 = vadd.f32 %v1815_v3, %v418_v42 }
 0x1ef   :  { %v458_v45 = vmax.f32 %v419_v43, 0.0 }
 0x1f0   :  { %v562_v46 = vpop.f32.mrf.mxu2 }
 0x1f1   :  { %v1905_v37 = vadd.f32 %v1852_v53, %v562_v46  ;;  %v476_v47 = vpack.c.bf16 %v458_v45, %v457_v44 }
 0x1f3   :  { %601 = vmatmul.bf16.gmra.mxu3 %v476_v47  ;;  %637 = vmax.xlane.f32.xlu1 %v1905_v37 }
 0x1f4   :  { %v421_v48 = vpop.f32.mrf.mxu3 }
 0x1f5   :  { %v422_v51 = vadd.f32 %v1815_v3, %v421_v48 }
 0x1f7   :  { %v459_v55 = vmax.f32 %v422_v51, 0.0 }
 0x1f8   :  { %v564_v49 = vpop.f32.mrf.mxu2 }
 0x1f9   :  { %v1909_v50 = vadd.f32 %v1852_v53, %v564_v49 }
 0x1fb   :  { %639 = vmax.xlane.f32.xlu2 %v1909_v50 }
 0x1fc   :  { %v423_v52 = vpop.f32.mrf.mxu3 }
 0x1fd   :  { %v424_v54 = vadd.f32 %v1815_v3, %v423_v52 }
 0x1ff   :  { %v460_v57 = vmax.f32 %v424_v54, 0.0 }
 0x200   :  { %v567_v58 = vpop.f32.mrf.mxu2 }
 0x201   :  { %v1915_v59 = vadd.f32 %v1852_v53, %v567_v58  ;;  %v477_v60 = vpack.c.bf16 %v460_v57, %v459_v55 }
 0x203   :  { %606 = vmatmul.bf16.gmra.mxu3 %v477_v60  ;;  %641 = vmax.xlane.f32.xlu0 %v1915_v59 }
 0x204   :  { %v426_v61 = vpop.f32.mrf.mxu3 }
 0x205   :  { %v427_v1 = vadd.f32 %v1815_v3, %v426_v61 }
 0x207   :  { %v461_v6 = vmax.f32 %v427_v1, 0.0 }
 0x208   :  { %v569_v62 = vpop.f32.mrf.mxu2 }
 0x209   :  { %v1919_v0 = vadd.f32 %v1852_v53, %v569_v62 }
 0x20b   :  { %643 = vmax.xlane.f32.xlu1 %v1919_v0 }
 0x20c   :  { %v428_v2 = vpop.f32.mrf.mxu3 }
 0x20d   :  { %v429_v5 = vadd.f32 %v1815_v3, %v428_v2 }
 0x20f   :  { %v462_v7 = vmax.f32 %v429_v5, 0.0 }
 0x210   :  { %v572_v8 = vpop.f32.mrf.mxu2 }
 0x211   :  { %v1925_v9 = vadd.f32 %v1852_v53, %v572_v8  ;;  %v478_v10 = vpack.c.bf16 %v462_v7, %v461_v6 }
 0x213   :  { %611 = vmatmul.bf16.gmra.mxu3 %v478_v10  ;;  %645 = vmax.xlane.f32.xlu2 %v1925_v9 }
 0x216   :  { %v618_v12 = vpop.xlane.xlu0 %617 }
 0x217   :  { %v681_v13 = vsub.f32 %v1855_v56, %v618_v12 }
 0x218   :  { %v574_v14 = vpop.f32.mrf.mxu2 }
 0x219   :  { %v713_v16 = vmul.f32 1.442695, %v681_v13  ;;  %v1930_v17 = vadd.f32 %v1852_v53, %v574_v14 }
 0x21b   :  { %1478 = vpow2.f32 %v713_v16  ;;  %647 = vmax.xlane.f32.xlu0 %v1930_v17 }
 0x21e   :  { %v620_v3 = vpop.xlane.xlu0 %619 }
 0x21f   :  { %v682_v18 = vsub.f32 %v1861_v63, %v620_v3 }
 0x220   :  { %v577_v19 = vpop.f32.mrf.mxu2 }
 0x221   :  { %v1934_v20 = vpop.eup %1478  ;;  %v715_v21 = vmul.f32 1.442695, %v682_v18  ;;  %v1937_v23 = vadd.f32 %v1852_v53, %v577_v19 }
 0x222   :  { %777 = vadd.xlane.f32.xlu2 %v1934_v20 }
 0x223   :  { %1480 = vpow2.f32 %v715_v21  ;;  %649 = vmax.xlane.f32.xlu1 %v1937_v23 }
 0x226   :  { %v622_v56 = vpop.xlane.xlu1 %621 }
 0x227   :  { %v683_v24 = vsub.f32 %v1865_v4, %v622_v56 }
 0x228   :  { %v579_v26 = vpop.f32.mrf.mxu2 }
 0x229   :  { %v1942_v27 = vpop.eup %1480  ;;  %v717_v29 = vmul.f32 1.442695, %v683_v24  ;;  %v1945_v63 = vadd.f32 %v1852_v53, %v579_v26 }
 0x22a   :  { %779 = vadd.xlane.f32.xlu0 %v1942_v27 }
 0x22b   :  { %1482 = vpow2.f32 %v717_v29  ;;  %651 = vmax.xlane.f32.xlu2 %v1945_v63 }
 0x22e   :  { %v624_v30 = vpop.xlane.xlu1 %623 }
 0x22f   :  { %v684_v31 = vsub.f32 %v1871_v11, %v624_v30 }
 0x230   :  { %v582_v32 = vpop.f32.mrf.mxu2 }
 0x231   :  { %v1950_v33 = vpop.eup %1482  ;;  %v719_v34 = vmul.f32 1.442695, %v684_v31  ;;  %v1953_v4 = vadd.f32 %v1852_v53, %v582_v32 }
 0x232   :  { %781 = vadd.xlane.f32.xlu1 %v1950_v33 }
 0x233   :  { %1484 = vpow2.f32 %v719_v34  ;;  %653 = vmax.xlane.f32.xlu0 %v1953_v4 }
 0x236   :  { %v626_v35 = vpop.xlane.xlu2 %625 }
 0x237   :  { %v685_v38 = vsub.f32 %v1875_v15, %v626_v35 }
 0x238   :  { %v584_v39 = vpop.f32.mrf.mxu2 }
 0x239   :  { %v1958_v41 = vpop.eup %1484  ;;  %v721_v42 = vmul.f32 1.442695, %v685_v38  ;;  %v1961_v11 = vadd.f32 %v1852_v53, %v584_v39 }
 0x23a   :  { %783 = vadd.xlane.f32.xlu2 %v1958_v41 }
 0x23b   :  { %1486 = vpow2.f32 %v721_v42  ;;  %655 = vmax.xlane.f32.xlu1 %v1961_v11 }
 0x23e   :  { %v628_v43 = vpop.xlane.xlu2 %627 }
 0x23f   :  { %v686_v44 = vsub.f32 %v1881_v22, %v628_v43 }
 0x240   :  { %v587_v45 = vpop.f32.mrf.mxu2 }
 0x241   :  { %v1966_v46 = vpop.eup %1486  ;;  %v723_v47 = vmul.f32 1.442695, %v686_v44  ;;  %v1969_v15 = vadd.f32 %v1852_v53, %v587_v45 }
 0x242   :  { %785 = vadd.xlane.f32.xlu0 %v1966_v46 }
 0x243   :  { %1488 = vpow2.f32 %v723_v47  ;;  %657 = vmax.xlane.f32.xlu2 %v1969_v15 }
 0x246   :  { %v630_v48 = vpop.xlane.xlu0 %629 }
 0x247   :  { %v687_v49 = vsub.f32 %v1885_v25, %v630_v48 }
 0x248   :  { %v589_v51 = vpop.f32.mrf.mxu2 }
 0x249   :  { %v1974_v52 = vpop.eup %1488  ;;  %v725_v54 = vmul.f32 1.442695, %v687_v49  ;;  %v1977_v22 = vadd.f32 %v1852_v53, %v589_v51 }
 0x24a   :  { %787 = vadd.xlane.f32.xlu1 %v1974_v52 }
 0x24b   :  { %1490 = vpow2.f32 %v725_v54  ;;  %659 = vmax.xlane.f32.xlu0 %v1977_v22 }
 0x24e   :  { %v632_v55 = vpop.xlane.xlu1 %631 }
 0x24f   :  { %v688_v57 = vsub.f32 %v1889_v28, %v632_v55 }
 0x250   :  { %v592_v58 = vpop.f32.mrf.mxu2 }
 0x251   :  { %v1982_v60 = vpop.eup %1490  ;;  %v727_v61 = vmul.f32 1.442695, %v688_v57  ;;  %v1985_v25 = vadd.f32 %v1852_v53, %v592_v58 }
 0x252   :  { %789 = vadd.xlane.f32.xlu2 %v1982_v60 }
 0x253   :  { %1492 = vpow2.f32 %v727_v61  ;;  %661 = vmax.xlane.f32.xlu1 %v1985_v25 }
 0x256   :  { %v634_v62 = vpop.xlane.xlu2 %633 }
 0x257   :  { %v689_v1 = vsub.f32 %v1895_v36, %v634_v62 }
 0x258   :  { %v594_v2 = vpop.f32.mrf.mxu2 }
 0x259   :  { %v1990_v5 = vpop.eup %1492  ;;  %v729_v6 = vmul.f32 1.442695, %v689_v1  ;;  %v1993_v28 = vadd.f32 %v1852_v53, %v594_v2 }
 0x25a   :  { %791 = vadd.xlane.f32.xlu0 %v1990_v5 }
 0x25b   :  { %1494 = vpow2.f32 %v729_v6  ;;  %663 = vmax.xlane.f32.xlu2 %v1993_v28 }
 0x25e   :  { %v636_v7 = vpop.xlane.xlu0 %635 }
 0x25f   :  { %v690_v8 = vsub.f32 %v1899_v40, %v636_v7 }
 0x261   :  { %v1998_v10 = vpop.eup %1494  ;;  %v731_v12 = vmul.f32 1.442695, %v690_v8 }
 0x262   :  { %793 = vadd.xlane.f32.xlu1 %v1998_v10 }
 0x263   :  { %1496 = vpow2.f32 %v731_v12 }
 0x266   :  { %v597_v36 = vpop.f32.mrf.mxu3  ;;  %v638_v13 = vpop.xlane.xlu1 %637 }
 0x267   :  { %v2002_v14 = vadd.f32 %v1852_v53, %v597_v36  ;;  %v691_v16 = vsub.f32 %v1905_v37, %v638_v13 }
 0x269   :  { %v2005_v3 = vpop.eup %1496  ;;  %v733_v18 = vmul.f32 1.442695, %v691_v16  ;;  %665 = vmax.xlane.f32.xlu0 %v2002_v14 }
 0x26a   :  { %795 = vadd.xlane.f32.xlu2 %v2005_v3 }
 0x26b   :  { %1498 = vpow2.f32 %v733_v18 }
 0x26e   :  { %v599_v40 = vpop.f32.mrf.mxu3  ;;  %v640_v29 = vpop.xlane.xlu2 %639 }
 0x26f   :  { %v2010_v19 = vadd.f32 %v1852_v53, %v599_v40  ;;  %v692_v58 = vsub.f32 %v1909_v50, %v640_v29 }
 0x271   :  { %v2012_v21 = vpop.eup %1498  ;;  %667 = vmax.xlane.f32.xlu1 %v2010_v19  ;;  %v735_v61 = vmul.f32 1.442695, %v692_v58 }
 0x272   :  { %797 = vadd.xlane.f32.xlu0 %v2012_v21 }
 0x276   :  { %v602_v56 = vpop.f32.mrf.mxu3  ;;  %v642_v31 = vpop.xlane.xlu0 %641 }
 0x277   :  { %v2017_v37 = vadd.f32 %v1852_v53, %v602_v56  ;;  %v693_v34 = vsub.f32 %v1915_v59, %v642_v31 }
 0x279   :  { %669 = vmax.xlane.f32.xlu2 %v2017_v37  ;;  %v737_v38 = vmul.f32 1.442695, %v693_v34 }
 0x27b   :  { %1500 = vpow2.f32 %v737_v38 }
 0x27e   :  { %v604_v24 = vpop.f32.mrf.mxu3  ;;  %v644_v42 = vpop.xlane.xlu1 %643 }
 0x27f   :  { %v2021_v26 = vadd.f32 %v1852_v53, %v604_v24  ;;  %v694_v45 = vsub.f32 %v1919_v0, %v644_v42 }
 0x281   :  { %671 = vmax.xlane.f32.xlu0 %v2021_v26  ;;  %v739_v49 = vmul.f32 1.442695, %v694_v45  ;;  %v2038_v57 = vpop.eup %1500 }
 0x286   :  { %v607_v30 = vpop.f32.mrf.mxu3  ;;  %v646_v35 = vpop.xlane.xlu2 %645 }
 0x287   :  { %v2025_v32 = vadd.f32 %v1852_v53, %v607_v30  ;;  %v695_v16 = vsub.f32 %v1925_v9, %v646_v35 }
 0x289   :  { %673 = vmax.xlane.f32.xlu1 %v2025_v32  ;;  %v741_v31 = vmul.f32 1.442695, %v695_v16 }
 0x28e   :  { %v609_v39 = vpop.f32.mrf.mxu3  ;;  %v648_v44 = vpop.xlane.xlu0 %647 }
 0x28f   :  { %v2030_v43 = vadd.f32 %v1852_v53, %v609_v39  ;;  %v696_v47 = vsub.f32 %v1930_v17, %v648_v44 }
 0x291   :  { %675 = vmax.xlane.f32.xlu2 %v2030_v43  ;;  %v743_v59 = vmul.f32 1.442695, %v696_v47 }
 0x295   :  { %v778_v48 = vpop.xlane.xlu2 %777 }
 0x296   :  { %1502 = vrcp.f32 %v778_v48  ;;  %v612_v51 = vpop.f32.mrf.mxu3  ;;  %v650_v55 = vpop.xlane.xlu1 %649  ;;  %v852_v12 = vand.u32 2147483648, %v778_v48  ;;  %vm846_vm2 = vweird.f32 %v778_v48 }
 0x297   :  { %v2036_v54 = vadd.f32 %v1852_v53, %v612_v51  ;;  %1504 = vpow2.f32 %v739_v49  ;;  %v697_v0 = vsub.f32 %v1937_v23, %v650_v55  ;;  %v850_v23 = vand.u32 2147483647, %v778_v48 }
 0x298   :  { %1506 = vpow2.f32 %v743_v59  ;;  %v853_v40 = vor.u32 1.1754944e-38, %v852_v12 }
 0x299   :  { %677 = vmax.xlane.f32.xlu0 %v2036_v54  ;;  %801 = vadd.xlane.f32.xlu2 %v2038_v57  ;;  %v745_v2 = vmul.f32 1.442695, %v697_v0  ;;  %vm851_vm4 = vcmp.eq.f32.partialorder %v850_v23, 8.507059e+37 }
 0x29c   :  { %v1503_v17 = vpop.eup %1502 }
 0x29d   :  { %v842_v62 = vmul.f32 %v1503_v17, %v778_v48  ;;  %v780_v1 = vpop.xlane.xlu0 %779  ;;  %v2047_v50 = vpop.eup %1504  ;;  %vm847_vm1 = vweird.f32 %v1503_v17 }
 0x29e   :  { %1508 = vrcp.f32 %v780_v1  ;;  %v614_v6 = vpop.f32.mrf.mxu3  ;;  %v2049_v36 = vpop.eup %1506  ;;  %vm848_vm3 = vmor %vm846_vm2, %vm847_vm1  ;;  %v867_v45 = vand.u32 2147483648, %v780_v1  ;;  %v865_v48 = vand.u32 2147483647, %v780_v1  ;;  %vm861_vm6 = vweird.f32 %v780_v1 }
 0x29f   :  { %v843_v7 = vsub.f32 1.0, %v842_v62  ;;  %v2045_v8 = vadd.f32 %v1852_v53, %v614_v6  ;;  %1510 = vpow2.f32 %v735_v61  ;;  %v652_v29 = vpop.xlane.xlu2 %651 }
 0x2a0   :  { %1512 = vpow2.f32 %v745_v2  ;;  %v868_v59 = vor.u32 1.1754944e-38, %v867_v45  ;;  %vm866_vm8 = vcmp.eq.f32.partialorder %v865_v48, 8.507059e+37 }
 0x2a1   :  { %v844_v13 = vmul.f32 %v1503_v17, %v843_v7  ;;  %679 = vmax.xlane.f32.xlu1 %v2045_v8  ;;  %803 = vadd.xlane.f32.xlu0 %v2047_v50 }
 0x2a2   :  { %807 = vadd.xlane.f32.xlu2 %v2049_v36 }
 0x2a3   :  { %v845_v53 = vadd.f32 %v1503_v17, %v844_v13 }
 0x2a4   :  { %v1509_v18 = vpop.eup %1508 }
 0x2a5   :  { %v849_v56 = vsel %vm848_vm3, %v1503_v17, %v845_v53  ;;  %v857_v24 = vmul.f32 %v1509_v18, %v780_v1  ;;  %v782_v30 = vpop.xlane.xlu1 %781  ;;  %v2055_v39 = vpop.eup %1510  ;;  %vm862_vm5 = vweird.f32 %v1509_v18 }
 0x2a6   :  { %v854_v34 = vsel %vm851_vm4, %v853_v40, %v849_v56  ;;  %1514 = vrcp.f32 %v782_v30  ;;  %v654_v38 = vpop.xlane.xlu0 %653  ;;  %v2059_v44 = vpop.eup %1512  ;;  %vm863_vm7 = vmor %vm861_vm6, %vm862_vm5  ;;  %v882_v1 = vand.u32 2147483648, %v782_v30  ;;  %v880_v23 = vand.u32 2147483647, %v782_v30 }
 0x2a7   :  { %v855_v9 = vmul.f32 %v1934_v20, %v854_v34  ;;  %v858_v35 = vsub.f32 1.0, %v857_v24  ;;  %v699_v42 = vsub.f32 %v1953_v4, %v654_v38  ;;  %1516 = vpow2.f32 %v741_v31 }
 0x2a8   :  { %v698_v20 = vsub.f32 %v1945_v63, %v652_v29  ;;  %vm876_vm10 = vweird.f32 %v782_v30  ;;  %v883_v53 = vor.u32 1.1754944e-38, %v882_v1  ;;  %vm881_vm12 = vcmp.eq.f32.partialorder %v880_v23, 8.507059e+37 }
 0x2a9   :  { %1321 = vst [vmem:[%s2297_s3] sm:$0xff] %v855_v9  ;;  %v859_v47 = vmul.f32 %v1509_v18, %v858_v35  ;;  %v749_v49 = vmul.f32 1.442695, %v699_v42  ;;  %799 = vadd.xlane.f32.xlu1 %v2055_v39  ;;  %809 = vadd.xlane.f32.xlu0 %v2059_v44 }
 0x2aa   :  { %v747_v61 = vmul.f32 1.442695, %v698_v20 }
 0x2ab   :  { %v860_v51 = vadd.f32 %v1509_v18, %v859_v47  ;;  %1518 = vpow2.f32 %v749_v49 }
 0x2ac   :  { %v1515_v4 = vpop.eup %1514 }
 0x2ad   :  { %v864_v55 = vsel %vm863_vm7, %v1509_v18, %v860_v51  ;;  %v872_v58 = vmul.f32 %v1515_v4, %v782_v30  ;;  %v784_v0 = vpop.xlane.xlu2 %783  ;;  %v2069_v63 = vpop.eup %1516  ;;  %vm877_vm9 = vweird.f32 %v1515_v4 }
 0x2ae   :  { %v869_v17 = vsel %vm866_vm8, %v868_v59, %v864_v55  ;;  %1520 = vrcp.f32 %v784_v0  ;;  %v656_v62 = vpop.xlane.xlu1 %655  ;;  %vm878_vm11 = vmor %vm876_vm10, %vm877_vm9  ;;  %v897_v35 = vand.u32 2147483648, %v784_v0  ;;  %v895_v45 = vand.u32 2147483647, %v784_v0 }
 0x2af   :  { %v870_v2 = vmul.f32 %v1942_v27, %v869_v17  ;;  %v873_v6 = vsub.f32 1.0, %v872_v58  ;;  %v700_v7 = vsub.f32 %v1961_v11, %v656_v62  ;;  %1522 = vpow2.f32 %v747_v61 }
 0x2b0   :  { %vm891_vm14 = vweird.f32 %v784_v0  ;;  %v898_v48 = vor.u32 1.1754944e-38, %v897_v35  ;;  %vm896_vm0 = vcmp.eq.f32.partialorder %v895_v45, 8.507059e+37 }
 0x2b1   :  { %v2071_v12 = vpop.eup %1518  ;;  %1322 = vst [vmem:[%s2297_s3 + $0x8] sm:$0xff] %v870_v2  ;;  %v874_v13 = vmul.f32 %v1515_v4, %v873_v6  ;;  %v751_v16 = vmul.f32 1.442695, %v700_v7  ;;  %805 = vadd.xlane.f32.xlu1 %v2069_v63 }
 0x2b2   :  { %813 = vadd.xlane.f32.xlu2 %v2071_v12 }
 0x2b3   :  { %v875_v27 = vadd.f32 %v1515_v4, %v874_v13  ;;  %1524 = vpow2.f32 %v751_v16 }
 0x2b4   :  { %v1521_v11 = vpop.eup %1520 }
 0x2b5   :  { %v879_v18 = vsel %vm878_vm11, %v1515_v4, %v875_v27  ;;  %v887_v40 = vmul.f32 %v1521_v11, %v784_v0  ;;  %v786_v56 = vpop.xlane.xlu0 %785  ;;  %v2080_v9 = vpop.eup %1522  ;;  %vm892_vm13 = vweird.f32 %v1521_v11 }
 0x2b6   :  { %v884_v24 = vsel %vm881_vm12, %v883_v53, %v879_v18  ;;  %1526 = vrcp.f32 %v786_v56  ;;  %v658_v29 = vpop.xlane.xlu2 %657  ;;  %vm893_vm15 = vmor %vm891_vm14, %vm892_vm13  ;;  %v912_v61 = vand.u32 2147483648, %v786_v56  ;;  %v910_v2 = vand.u32 2147483647, %v786_v56 }
 0x2b7   :  { %v885_v31 = vmul.f32 %v1950_v33, %v884_v24  ;;  %v888_v34 = vsub.f32 1.0, %v887_v40  ;;  %v701_v38 = vsub.f32 %v1969_v15, %v658_v29  ;;  %vm906_vm2 = vweird.f32 %v786_v56 }
 0x2b8   :  { %v913_v1 = vor.u32 1.1754944e-38, %v912_v61  ;;  %vm911_vm4 = vcmp.eq.f32.partialorder %v910_v2, 8.507059e+37 }
 0x2b9   :  { %v2082_v30 = vpop.eup %1524  ;;  %1323 = vst [vmem:[%s2297_s3 + $0x10] sm:$0xff] %v885_v31  ;;  %v889_v42 = vmul.f32 %v1521_v11, %v888_v34  ;;  %v753_v47 = vmul.f32 1.442695, %v701_v38  ;;  %811 = vadd.xlane.f32.xlu1 %v2080_v9 }
 0x2ba   :  { %815 = vadd.xlane.f32.xlu0 %v2082_v30 }
 0x2bb   :  { %v890_v33 = vadd.f32 %v1521_v11, %v889_v42  ;;  %1528 = vpow2.f32 %v753_v47 }
 0x2bc   :  { %v1527_v15 = vpop.eup %1526 }
 0x2bd   :  { %v894_v49 = vsel %vm893_vm15, %v1521_v11, %v890_v33  ;;  %v902_v20 = vmul.f32 %v1527_v15, %v786_v56  ;;  %v788_v51 = vpop.xlane.xlu1 %787  ;;  %vm907_vm1 = vweird.f32 %v1527_v15 }
 0x2be   :  { %v899_v4 = vsel %vm896_vm0, %v898_v48, %v894_v49  ;;  %1530 = vrcp.f32 %v788_v51  ;;  %v660_v59 = vpop.xlane.xlu0 %659  ;;  %vm908_vm3 = vmor %vm906_vm2, %vm907_vm1  ;;  %v927_v40 = vand.u32 2147483648, %v788_v51  ;;  %v925_v29 = vand.u32 2147483647, %v788_v51 }
 0x2bf   :  { %v900_v55 = vmul.f32 %v1958_v41, %v899_v4  ;;  %v903_v58 = vsub.f32 1.0, %v902_v20  ;;  %v702_v17 = vsub.f32 %v1977_v22, %v660_v59  ;;  %vm921_vm6 = vweird.f32 %v788_v51 }
 0x2c0   :  { %v928_v38 = vor.u32 1.1754944e-38, %v927_v40  ;;  %vm926_vm8 = vcmp.eq.f32.partialorder %v925_v29, 8.507059e+37 }
 0x2c1   :  { %v2091_v62 = vpop.eup %1528  ;;  %1324 = vst [vmem:[%s2297_s3 + $0x18] sm:$0xff] %v900_v55  ;;  %v904_v0 = vmul.f32 %v1527_v15, %v903_v58  ;;  %v755_v6 = vmul.f32 1.442695, %v702_v17 }
 0x2c2   :  { %817 = vadd.xlane.f32.xlu1 %v2091_v62 }
 0x2c3   :  { %v905_v7 = vadd.f32 %v1527_v15, %v904_v0  ;;  %1532 = vpow2.f32 %v755_v6 }
 0x2c4   :  { %v1531_v41 = vpop.eup %1530 }
 0x2c5   :  { %v909_v22 = vsel %vm908_vm3, %v1527_v15, %v905_v7  ;;  %v917_v13 = vmul.f32 %v1531_v41, %v788_v51  ;;  %v790_v23 = vpop.xlane.xlu2 %789  ;;  %vm922_vm5 = vweird.f32 %v1531_v41 }
 0x2c6   :  { %v914_v16 = vsel %vm911_vm4, %v913_v1, %v909_v22  ;;  %1534 = vrcp.f32 %v790_v23  ;;  %v662_v27 = vpop.xlane.xlu1 %661  ;;  %vm923_vm7 = vmor %vm921_vm6, %vm922_vm5  ;;  %v942_v49 = vand.u32 2147483648, %v790_v23  ;;  %v940_v4 = vand.u32 2147483647, %v790_v23 }
 0x2c7   :  { %v915_v11 = vmul.f32 %v1966_v46, %v914_v16  ;;  %v918_v53 = vsub.f32 1.0, %v917_v13  ;;  %v703_v18 = vsub.f32 %v1985_v25, %v662_v27  ;;  %vm936_vm10 = vweird.f32 %v790_v23 }
 0x2c8   :  { %v943_v58 = vor.u32 1.1754944e-38, %v942_v49  ;;  %vm941_vm12 = vcmp.eq.f32.partialorder %v940_v4, 8.507059e+37 }
 0x2c9   :  { %v2099_v24 = vpop.eup %1532  ;;  %1325 = vst [vmem:[%s2297_s3 + $0x20] sm:$0xff] %v915_v11  ;;  %v919_v56 = vmul.f32 %v1531_v41, %v918_v53  ;;  %v757_v31 = vmul.f32 1.442695, %v703_v18 }
 0x2ca   :  { %819 = vadd.xlane.f32.xlu2 %v2099_v24 }
 0x2cb   :  { %v920_v34 = vadd.f32 %v1531_v41, %v919_v56  ;;  %1536 = vpow2.f32 %v757_v31 }
 0x2cc   :  { %v1535_v46 = vpop.eup %1534 }
 0x2cd   :  { %v924_v25 = vsel %vm923_vm7, %v1531_v41, %v920_v34  ;;  %v932_v35 = vmul.f32 %v1535_v46, %v790_v23  ;;  %v792_v42 = vpop.xlane.xlu0 %791  ;;  %vm937_vm9 = vweird.f32 %v1535_v46 }
 0x2ce   :  { %v929_v45 = vsel %vm926_vm8, %v928_v38, %v924_v25  ;;  %1538 = vrcp.f32 %v792_v42  ;;  %v664_v47 = vpop.xlane.xlu2 %663  ;;  %vm938_vm11 = vmor %vm936_vm10, %vm937_vm9  ;;  %v957_v7 = vand.u32 2147483648, %v792_v42  ;;  %v955_v22 = vand.u32 2147483647, %v792_v42 }
 0x2cf   :  { %v930_v33 = vmul.f32 %v1974_v52, %v929_v45  ;;  %v933_v15 = vsub.f32 1.0, %v932_v35  ;;  %v704_v48 = vsub.f32 %v1993_v28, %v664_v47  ;;  %vm951_vm14 = vweird.f32 %v792_v42 }
 0x2d0   :  { %v958_v16 = vor.u32 1.1754944e-38, %v957_v7  ;;  %vm956_vm0 = vcmp.eq.f32.partialorder %v955_v22, 8.507059e+37 }
 0x2d1   :  { %v2107_v20 = vpop.eup %1536  ;;  %1326 = vst [vmem:[%s2297_s3 + $0x28] sm:$0xff] %v930_v33  ;;  %v934_v51 = vmul.f32 %v1535_v46, %v933_v15  ;;  %v759_v59 = vmul.f32 1.442695, %v704_v48 }
 0x2d2   :  { %821 = vadd.xlane.f32.xlu0 %v2107_v20 }
 0x2d3   :  { %v935_v55 = vadd.f32 %v1535_v46, %v934_v51  ;;  %1540 = vpow2.f32 %v759_v59 }
 0x2d4   :  { %v1539_v52 = vpop.eup %1538 }
 0x2d5   :  { %v939_v28 = vsel %vm938_vm11, %v1535_v46, %v935_v55  ;;  %v947_v17 = vmul.f32 %v1539_v52, %v792_v42  ;;  %v794_v61 = vpop.xlane.xlu1 %793  ;;  %vm952_vm13 = vweird.f32 %v1539_v52 }
 0x2d6   :  { %v944_v0 = vsel %vm941_vm12, %v943_v58, %v939_v28  ;;  %1542 = vrcp.f32 %v794_v61  ;;  %vm953_vm15 = vmor %vm951_vm14, %vm952_vm13  ;;  %v972_v34 = vand.u32 2147483648, %v794_v61  ;;  %v970_v38 = vand.u32 2147483647, %v794_v61 }
 0x2d7   :  { %v945_v2 = vmul.f32 %v1982_v60, %v944_v0  ;;  %v948_v6 = vsub.f32 1.0, %v947_v17  ;;  %vm966_vm2 = vweird.f32 %v794_v61 }
 0x2d8   :  { %vm971_vm4 = vcmp.eq.f32.partialorder %v970_v38, 8.507059e+37 }
 0x2d9   :  { %v2114_v41 = vpop.eup %1540  ;;  %1327 = vst [vmem:[%s2297_s3 + $0x30] sm:$0xff] %v945_v2  ;;  %v949_v1 = vmul.f32 %v1539_v52, %v948_v6 }
 0x2da   :  { %823 = vadd.xlane.f32.xlu1 %v2114_v41 }
 0x2db   :  { %v950_v13 = vadd.f32 %v1539_v52, %v949_v1 }
 0x2dc   :  { %v1543_v23 = vpop.eup %1542  ;;  %v666_v27 = vpop.xlane.xlu0 %665 }
 0x2dd   :  { %v954_v60 = vsel %vm953_vm15, %v1539_v52, %v950_v13  ;;  %v962_v11 = vmul.f32 %v1543_v23, %v794_v61  ;;  %v705_v53 = vsub.f32 %v2002_v14, %v666_v27  ;;  %v796_v18 = vpop.xlane.xlu2 %795  ;;  %vm967_vm1 = vweird.f32 %v1543_v23 }
 0x2de   :  { %v959_v40 = vsel %vm956_vm0, %v958_v16, %v954_v60  ;;  %1544 = vrcp.f32 %v796_v18  ;;  %vm968_vm3 = vmor %vm966_vm2, %vm967_vm1  ;;  %v973_v14 = vor.u32 1.1754944e-38, %v972_v34  ;;  %v987_v59 = vand.u32 2147483648, %v796_v18 }
 0x2df   :  { %v960_v56 = vmul.f32 %v1990_v5, %v959_v40  ;;  %v963_v29 = vsub.f32 1.0, %v962_v11  ;;  %v761_v31 = vmul.f32 1.442695, %v705_v53  ;;  %v985_v52 = vand.u32 2147483647, %v796_v18 }
 0x2e0   :  { %vm981_vm6 = vweird.f32 %v796_v18  ;;  %v988_v28 = vor.u32 1.1754944e-38, %v987_v59 }
 0x2e1   :  { %1328 = vst [vmem:[%s2297_s3 + $0x38] sm:$0xff] %v960_v56  ;;  %v964_v46 = vmul.f32 %v1543_v23, %v963_v29  ;;  %1546 = vpow2.f32 %v761_v31  ;;  %vm986_vm8 = vcmp.eq.f32.partialorder %v985_v52, 8.507059e+37 }
 0x2e3   :  { %v965_v25 = vadd.f32 %v1543_v23, %v964_v46 }
 0x2e4   :  { %v1545_v35 = vpop.eup %1544  ;;  %v668_v42 = vpop.xlane.xlu1 %667 }
 0x2e5   :  { %v969_v45 = vsel %vm968_vm3, %v1543_v23, %v965_v25  ;;  %v977_v5 = vmul.f32 %v1545_v35, %v796_v18  ;;  %v706_v47 = vsub.f32 %v2010_v19, %v668_v42  ;;  %v798_v33 = vpop.xlane.xlu0 %797  ;;  %vm982_vm5 = vweird.f32 %v1545_v35 }
 0x2e6   :  { %v974_v15 = vsel %vm971_vm4, %v973_v14, %v969_v45  ;;  %1548 = vrcp.f32 %v798_v33  ;;  %vm983_vm7 = vmor %vm981_vm6, %vm982_vm5  ;;  %v1002_v13 = vand.u32 2147483648, %v798_v33  ;;  %v1000_v16 = vand.u32 2147483647, %v798_v33 }
 0x2e7   :  { %v2126_v48 = vpop.eup %1546  ;;  %v975_v49 = vmul.f32 %v1998_v10, %v974_v15  ;;  %v978_v51 = vsub.f32 1.0, %v977_v5  ;;  %v763_v4 = vmul.f32 1.442695, %v706_v47  ;;  %vm996_vm10 = vweird.f32 %v798_v33 }
 0x2e8   :  { %825 = vadd.xlane.f32.xlu2 %v2126_v48  ;;  %vm1001_vm12 = vcmp.eq.f32.partialorder %v1000_v16, 8.507059e+37 }
 0x2e9   :  { %1329 = vst [vmem:[%s2297_s3 + $0x40] sm:$0xff] %v975_v49  ;;  %v979_v55 = vmul.f32 %v1545_v35, %v978_v51  ;;  %1550 = vpow2.f32 %v763_v4 }
 0x2eb   :  { %v980_v19 = vadd.f32 %v1545_v35, %v979_v55 }
 0x2ec   :  { %v1549_v58 = vpop.eup %1548  ;;  %v670_v17 = vpop.xlane.xlu2 %669 }
 0x2ed   :  { %v984_v10 = vsel %vm983_vm7, %v1545_v35, %v980_v19  ;;  %v992_v61 = vmul.f32 %v1549_v58, %v798_v33  ;;  %v707_v0 = vsub.f32 %v2017_v37, %v670_v17  ;;  %vm997_vm9 = vweird.f32 %v1549_v58 }
 0x2ee   :  { %v989_v2 = vsel %vm986_vm8, %v988_v28, %v984_v10  ;;  %vm998_vm11 = vmor %vm996_vm10, %vm997_vm9  ;;  %v1003_v37 = vor.u32 1.1754944e-38, %v1002_v13 }
 0x2ef   :  { %v2134_v6 = vpop.eup %1550  ;;  %v990_v7 = vmul.f32 %v2005_v3, %v989_v2  ;;  %v993_v1 = vsub.f32 1.0, %v992_v61  ;;  %v765_v22 = vmul.f32 1.442695, %v707_v0 }
 0x2f0   :  { %827 = vadd.xlane.f32.xlu0 %v2134_v6 }
 0x2f1   :  { %1330 = vst [vmem:[%s2297_s3 + $0x48] sm:$0xff] %v990_v7  ;;  %v994_v23 = vmul.f32 %v1549_v58, %v993_v1  ;;  %1552 = vpow2.f32 %v765_v22 }
 0x2f3   :  { %v995_v27 = vadd.f32 %v1549_v58, %v994_v23 }
 0x2f4   :  { %v672_v60 = vpop.xlane.xlu0 %671 }
 0x2f5   :  { %v999_v11 = vsel %vm998_vm11, %v1549_v58, %v995_v27  ;;  %v708_v3 = vsub.f32 %v2021_v26, %v672_v60 }
 0x2f6   :  { %v1004_v53 = vsel %vm1001_vm12, %v1003_v37, %v999_v11 }
 0x2f7   :  { %v2142_v18 = vpop.eup %1552  ;;  %v1005_v40 = vmul.f32 %v2012_v21, %v1004_v53  ;;  %v767_v56 = vmul.f32 1.442695, %v708_v3 }
 0x2f8   :  { %829 = vadd.xlane.f32.xlu1 %v2142_v18 }
 0x2f9   :  { %1331 = vst [vmem:[%s2297_s3 + $0x50] sm:$0xff] %v1005_v40  ;;  %1554 = vpow2.f32 %v767_v56 }
 0x2fc   :  { %v674_v29 = vpop.xlane.xlu1 %673 }
 0x2fd   :  { %v709_v31 = vsub.f32 %v2025_v32, %v674_v29 }
 0x2ff   :  { %v2150_v34 = vpop.eup %1554  ;;  %v769_v46 = vmul.f32 1.442695, %v709_v31 }
 0x300   :  { %831 = vadd.xlane.f32.xlu2 %v2150_v34 }
 0x301   :  { %1556 = vpow2.f32 %v769_v46 }
 0x304   :  { %v676_v26 = vpop.xlane.xlu2 %675 }
 0x305   :  { %v710_v21 = vsub.f32 %v2030_v43, %v676_v26 }
 0x307   :  { %v2154_v38 = vpop.eup %1556  ;;  %v771_v25 = vmul.f32 1.442695, %v710_v21 }
 0x308   :  { %833 = vadd.xlane.f32.xlu0 %v2154_v38 }
 0x309   :  { %1558 = vpow2.f32 %v771_v25 }
 0x30c   :  { %v802_v35 = vpop.xlane.xlu2 %801  ;;  %v678_v14 = vpop.xlane.xlu0 %677 }
 0x30d   :  { %1560 = vrcp.f32 %v802_v35  ;;  %v711_v32 = vsub.f32 %v2036_v54, %v678_v14  ;;  %v1032_v4 = vand.u32 2147483648, %v802_v35  ;;  %v1030_v52 = vand.u32 2147483647, %v802_v35 }
 0x30e   :  { %vm1026_vm14 = vweird.f32 %v802_v35 }
 0x30f   :  { %v2158_v42 = vpop.eup %1558  ;;  %v773_v45 = vmul.f32 1.442695, %v711_v32  ;;  %v1033_v28 = vor.u32 1.1754944e-38, %v1032_v4  ;;  %vm1031_vm0 = vcmp.eq.f32.partialorder %v1030_v52, 8.507059e+37 }
 0x310   :  { %835 = vadd.xlane.f32.xlu1 %v2158_v42 }
 0x311   :  { %1562 = vpow2.f32 %v773_v45 }
 0x313   :  { %v1561_v5 = vpop.eup %1560 }
 0x314   :  { %v1022_v47 = vmul.f32 %v1561_v5, %v802_v35  ;;  %v680_v43 = vpop.xlane.xlu1 %679  ;;  %v804_v33 = vpop.xlane.xlu0 %803  ;;  %vm1027_vm13 = vweird.f32 %v1561_v5 }
 0x315   :  { %v712_v15 = vsub.f32 %v2045_v8, %v680_v43  ;;  %v808_v49 = vpop.xlane.xlu2 %807  ;;  %1564 = vrcp.f32 %v804_v33  ;;  %vm1028_vm15 = vmor %vm1026_vm14, %vm1027_vm13  ;;  %v1047_v16 = vand.u32 2147483648, %v804_v33  ;;  %v1045_v60 = vand.u32 2147483647, %v804_v33 }
 0x316   :  { %v1023_v51 = vsub.f32 1.0, %v1022_v47  ;;  %1566 = vrcp.f32 %v808_v49  ;;  %v1077_v27 = vand.u32 2147483648, %v808_v49  ;;  %vm1041_vm3 = vweird.f32 %v804_v33 }
 0x317   :  { %v775_v59 = vmul.f32 1.442695, %v712_v15  ;;  %v2162_v55 = vpop.eup %1562  ;;  %vm1071_vm4 = vweird.f32 %v808_v49  ;;  %v1048_v56 = vor.u32 1.1754944e-38, %v1047_v16  ;;  %vm1046_vm7 = vcmp.eq.f32.partialorder %v1045_v60, 8.507059e+37 }
 0x318   :  { %v1024_v54 = vmul.f32 %v1561_v5, %v1023_v51  ;;  %837 = vadd.xlane.f32.xlu2 %v2162_v55  ;;  %v1078_v29 = vor.u32 1.1754944e-38, %v1077_v27 }
 0x319   :  { %1568 = vpow2.f32 %v775_v59 }
 0x31a   :  { %v1025_v19 = vadd.f32 %v1561_v5, %v1024_v54 }
 0x31b   :  { %v1565_v58 = vpop.eup %1564 }
 0x31c   :  { %v1567_v8 = vpop.eup %1566  ;;  %v1029_v17 = vsel %vm1028_vm15, %v1561_v5, %v1025_v19  ;;  %v1037_v10 = vmul.f32 %v1565_v58, %v804_v33  ;;  %v2165_v61 = vpop.xlane.xlu1 %799  ;;  %vm1042_vm1 = vweird.f32 %v1565_v58 }
 0x31d   :  { %v2167_v0 = vpop.xlane.xlu0 %809  ;;  %v1034_v2 = vsel %vm1031_vm0, %v1033_v28, %v1029_v17  ;;  %v1067_v7 = vmul.f32 %v1567_v8, %v808_v49  ;;  %1570 = vrcp.f32 %v2165_v61  ;;  %vm1072_vm2 = vweird.f32 %v1567_v8  ;;  %vm1043_vm5 = vmor %vm1041_vm3, %vm1042_vm1 }
 0x31e   :  { %v1035_v1 = vmul.f32 %v2038_v57, %v1034_v2  ;;  %v1038_v22 = vsub.f32 1.0, %v1037_v10  ;;  %1572 = vrcp.f32 %v2167_v0  ;;  %v1075_v57 = vand.u32 2147483647, %v808_v49  ;;  %vm1073_vm6 = vmor %vm1071_vm4, %vm1072_vm2 }
 0x31f   :  { %v2171_v13 = vpop.eup %1568  ;;  %v1068_v23 = vsub.f32 1.0, %v1067_v7  ;;  %v1015_v33 = vand.u32 2147483647, %v2165_v61  ;;  %v1017_v15 = vand.u32 2147483648, %v2165_v61  ;;  %vm1011_vm10 = vweird.f32 %v2165_v61 }
 0x320   :  { %1333 = vst [vmem:[%s2297_s3 + $0x60] sm:$0xff] %v1035_v1  ;;  %v1039_v37 = vmul.f32 %v1565_v58, %v1038_v22  ;;  %839 = vadd.xlane.f32.xlu0 %v2171_v13  ;;  %vm1076_vm8 = vcmp.eq.f32.partialorder %v1075_v57, 8.507059e+37  ;;  %v1090_v59 = vand.u32 2147483647, %v2167_v0  ;;  %vm1086_vm13 = vweird.f32 %v2167_v0 }
 0x321   :  { %v1069_v11 = vmul.f32 %v1567_v8, %v1068_v23  ;;  %v1018_v52 = vor.u32 1.1754944e-38, %v1017_v15  ;;  %vm1016_vm14 = vcmp.eq.f32.partialorder %v1015_v33, 8.507059e+37 }
 0x322   :  { %v1040_v3 = vadd.f32 %v1565_v58, %v1039_v37  ;;  %vm1091_vm0 = vcmp.eq.f32.partialorder %v1090_v59, 8.507059e+37 }
 0x323   :  { %v1571_v53 = vpop.eup %1570  ;;  %v1070_v40 = vadd.f32 %v1567_v8, %v1069_v11 }
 0x324   :  { %v1044_v31 = vsel %vm1043_vm5, %v1565_v58, %v1040_v3  ;;  %v1007_v46 = vmul.f32 %v1571_v53, %v2165_v61  ;;  %v2179_v26 = vpop.xlane.xlu1 %805  ;;  %v1573_v21 = vpop.eup %1572  ;;  %vm1012_vm9 = vweird.f32 %v1571_v53 }
 0x325   :  { %v1074_v25 = vsel %vm1073_vm6, %v1567_v8, %v1070_v40  ;;  %v1049_v35 = vsel %vm1046_vm7, %v1048_v56, %v1044_v31  ;;  %1574 = vrcp.f32 %v2179_v26  ;;  %v2182_v14 = vpop.xlane.xlu2 %813  ;;  %v1082_v47 = vmul.f32 %v1573_v21, %v2167_v0  ;;  %vm1013_vm12 = vmor %vm1011_vm10, %vm1012_vm9 }
 0x326   :  { %v1079_v32 = vsel %vm1076_vm8, %v1078_v29, %v1074_v25  ;;  %v1050_v45 = vmul.f32 %v2047_v50, %v1049_v35  ;;  %v1008_v5 = vsub.f32 1.0, %v1007_v46  ;;  %1576 = vrcp.f32 %v2182_v14 }
 0x327   :  { %v1080_v43 = vmul.f32 %v2049_v36, %v1079_v32  ;;  %v1083_v51 = vsub.f32 1.0, %v1082_v47  ;;  %v1092_v50 = vand.u32 2147483648, %v2167_v0  ;;  %vm1087_vm11 = vweird.f32 %v1573_v21 }
 0x328   :  { %1334 = vst [vmem:[%s2297_s3 + $0x68] sm:$0xff] %v1050_v45  ;;  %v1009_v49 = vmul.f32 %v1571_v53, %v1008_v5  ;;  %vm1088_vm15 = vmor %vm1086_vm13, %vm1087_vm11  ;;  %v1060_v23 = vand.u32 2147483647, %v2179_v26  ;;  %v1062_v16 = vand.u32 2147483648, %v2179_v26  ;;  %vm1056_vm2 = vweird.f32 %v2179_v26 }
 0x329   :  { %1336 = vst [vmem:[%s2297_s3 + $0x78] sm:$0xff] %v1080_v43  ;;  %v1084_v4 = vmul.f32 %v1573_v21, %v1083_v51  ;;  %v1093_v10 = vor.u32 1.1754944e-38, %v1092_v50  ;;  %v1122_v57 = vand.u32 2147483648, %v2182_v14  ;;  %vm1116_vm6 = vweird.f32 %v2182_v14 }
 0x32a   :  { %v1010_v36 = vadd.f32 %v1571_v53, %v1009_v49  ;;  %vm1061_vm5 = vcmp.eq.f32.partialorder %v1060_v23, 8.507059e+37 }
 0x32b   :  { %v1575_v54 = vpop.eup %1574  ;;  %v1085_v58 = vadd.f32 %v1573_v21, %v1084_v4  ;;  %v1123_v35 = vor.u32 1.1754944e-38, %v1122_v57 }
 0x32c   :  { %v1014_v19 = vsel %vm1013_vm12, %v1571_v53, %v1010_v36  ;;  %v1052_v28 = vmul.f32 %v1575_v54, %v2179_v26  ;;  %v2201_v8 = vpop.xlane.xlu1 %811  ;;  %v1577_v2 = vpop.eup %1576  ;;  %vm1057_vm1 = vweird.f32 %v1575_v54  ;;  %v1063_v53 = vor.u32 1.1754944e-38, %v1062_v16 }
 0x32d   :  { %v1019_v17 = vsel %vm1016_vm14, %v1018_v52, %v1014_v19  ;;  %1578 = vrcp.f32 %v2201_v8  ;;  %v2204_v61 = vpop.xlane.xlu0 %815  ;;  %v1089_v1 = vsel %vm1088_vm15, %v1573_v21, %v1085_v58  ;;  %v1112_v27 = vmul.f32 %v1577_v2, %v2182_v14  ;;  %vm1058_vm3 = vmor %vm1056_vm2, %vm1057_vm1 }
 0x32e   :  { %v1020_v7 = vmul.f32 %v2055_v39, %v1019_v17  ;;  %v1053_v0 = vsub.f32 1.0, %v1052_v28  ;;  %v1094_v22 = vsel %vm1091_vm0, %v1093_v10, %v1089_v1  ;;  %1580 = vrcp.f32 %v2204_v61 }
 0x32f   :  { %v1095_v37 = vmul.f32 %v2059_v44, %v1094_v22  ;;  %v1113_v39 = vsub.f32 1.0, %v1112_v27  ;;  %vm1117_vm4 = vweird.f32 %v1577_v2  ;;  %v1120_v44 = vand.u32 2147483647, %v2182_v14 }
 0x330   :  { %1332 = vst [vmem:[%s2297_s3 + $0x58] sm:$0xff] %v1020_v7  ;;  %v1054_v60 = vmul.f32 %v1575_v54, %v1053_v0  ;;  %vm1118_vm7 = vmor %vm1116_vm6, %vm1117_vm4  ;;  %v1107_v5 = vand.u32 2147483648, %v2201_v8  ;;  %v1105_v33 = vand.u32 2147483647, %v2201_v8  ;;  %vm1101_vm10 = vweird.f32 %v2201_v8 }
 0x331   :  { %1337 = vst [vmem:[%s2297_s3 + $0x80] sm:$0xff] %v1095_v37  ;;  %v1114_v40 = vmul.f32 %v1577_v2, %v1113_v39  ;;  %vm1121_vm8 = vcmp.eq.f32.partialorder %v1120_v44, 8.507059e+37  ;;  %v1137_v51 = vand.u32 2147483648, %v2204_v61  ;;  %v1135_v4 = vand.u32 2147483647, %v2204_v61 }
 0x332   :  { %v1055_v11 = vadd.f32 %v1575_v54, %v1054_v60  ;;  %v1108_v50 = vor.u32 1.1754944e-38, %v1107_v5  ;;  %vm1106_vm13 = vcmp.eq.f32.partialorder %v1105_v33, 8.507059e+37  ;;  %vm1131_vm14 = vweird.f32 %v2204_v61 }
 0x333   :  { %v1579_v3 = vpop.eup %1578  ;;  %v1115_v46 = vadd.f32 %v1577_v2, %v1114_v40  ;;  %vm1136_vm0 = vcmp.eq.f32.partialorder %v1135_v4, 8.507059e+37 }
 0x334   :  { %v1059_v56 = vsel %vm1058_vm3, %v1575_v54, %v1055_v11  ;;  %v1097_v29 = vmul.f32 %v1579_v3, %v2201_v8  ;;  %v1581_v25 = vpop.eup %1580  ;;  %vm1102_vm9 = vweird.f32 %v1579_v3  ;;  %v1138_v8 = vor.u32 1.1754944e-38, %v1137_v51 }
 0x335   :  { %v1064_v31 = vsel %vm1061_vm5, %v1063_v53, %v1059_v56  ;;  %v818_v21 = vpop.xlane.xlu1 %817  ;;  %v1119_v45 = vsel %vm1118_vm7, %v1577_v2, %v1115_v46  ;;  %v1127_v47 = vmul.f32 %v1581_v25, %v2204_v61  ;;  %vm1103_vm11 = vmor %vm1101_vm10, %vm1102_vm9  ;;  %vm1132_vm12 = vweird.f32 %v1581_v25 }
 0x336   :  { %v1065_v26 = vmul.f32 %v2069_v63, %v1064_v31  ;;  %v1098_v32 = vsub.f32 1.0, %v1097_v29  ;;  %1582 = vrcp.f32 %v818_v21  ;;  %v1124_v43 = vsel %vm1121_vm8, %v1123_v35, %v1119_v45  ;;  %vm1133_vm15 = vmor %vm1131_vm14, %vm1132_vm12 }
 0x337   :  { %v1125_v63 = vmul.f32 %v2071_v12, %v1124_v43  ;;  %v1128_v15 = vsub.f32 1.0, %v1127_v47  ;;  %v1152_v7 = vand.u32 2147483648, %v818_v21  ;;  %v1150_v61 = vand.u32 2147483647, %v818_v21 }
 0x338   :  { %1335 = vst [vmem:[%s2297_s3 + $0x70] sm:$0xff] %v1065_v26  ;;  %v1099_v14 = vmul.f32 %v1579_v3, %v1098_v32  ;;  %vm1146_vm2 = vweird.f32 %v818_v21 }
 0x339   :  { %1339 = vst [vmem:[%s2297_s3 + $0x90] sm:$0xff] %v1125_v63  ;;  %v1129_v36 = vmul.f32 %v1581_v25, %v1128_v15  ;;  %v1153_v23 = vor.u32 1.1754944e-38, %v1152_v7  ;;  %vm1151_vm4 = vcmp.eq.f32.partialorder %v1150_v61, 8.507059e+37 }
 0x33a   :  { %v1100_v49 = vadd.f32 %v1579_v3, %v1099_v14 }
 0x33b   :  { %v1130_v52 = vadd.f32 %v1581_v25, %v1129_v36 }
 0x33c   :  { %v1583_v59 = vpop.eup %1582  ;;  %v1104_v54 = vsel %vm1103_vm11, %v1579_v3, %v1100_v49 }
 0x33d   :  { %v1109_v12 = vsel %vm1106_vm13, %v1108_v50, %v1104_v54  ;;  %v1142_v19 = vmul.f32 %v1583_v59, %v818_v21  ;;  %v820_v58 = vpop.xlane.xlu2 %819  ;;  %v1134_v17 = vsel %vm1133_vm15, %v1581_v25, %v1130_v52  ;;  %vm1147_vm1 = vweird.f32 %v1583_v59 }
 0x33e   :  { %v1110_v28 = vmul.f32 %v2080_v9, %v1109_v12  ;;  %1584 = vrcp.f32 %v820_v58  ;;  %v1139_v2 = vsel %vm1136_vm0, %v1138_v8, %v1134_v17  ;;  %vm1148_vm3 = vmor %vm1146_vm2, %vm1147_vm1  ;;  %v1167_v11 = vand.u32 2147483648, %v820_v58 }
 0x33f   :  { %v1143_v10 = vsub.f32 1.0, %v1142_v19  ;;  %v1140_v1 = vmul.f32 %v2082_v30, %v1139_v2  ;;  %v1165_v3 = vand.u32 2147483647, %v820_v58  ;;  %vm1161_vm6 = vweird.f32 %v820_v58 }
 0x340   :  { %1338 = vst [vmem:[%s2297_s3 + $0x88] sm:$0xff] %v1110_v28  ;;  %v1168_v44 = vor.u32 1.1754944e-38, %v1167_v11 }
 0x341   :  { %v1144_v0 = vmul.f32 %v1583_v59, %v1143_v10  ;;  %1340 = vst [vmem:[%s2297_s3 + $0x98] sm:$0xff] %v1140_v1  ;;  %vm1166_vm8 = vcmp.eq.f32.partialorder %v1165_v3, 8.507059e+37 }
 0x343   :  { %v1145_v9 = vadd.f32 %v1583_v59, %v1144_v0 }
 0x344   :  { %v1585_v22 = vpop.eup %1584 }
 0x345   :  { %v1149_v16 = vsel %vm1148_vm3, %v1583_v59, %v1145_v9  ;;  %v1157_v27 = vmul.f32 %v1585_v22, %v820_v58  ;;  %v822_v37 = vpop.xlane.xlu0 %821  ;;  %vm1162_vm5 = vweird.f32 %v1585_v22 }
 0x346   :  { %v1154_v60 = vsel %vm1151_vm4, %v1153_v23, %v1149_v16  ;;  %1586 = vrcp.f32 %v822_v37  ;;  %vm1163_vm7 = vmor %vm1161_vm6, %vm1162_vm5  ;;  %v1182_v25 = vand.u32 2147483648, %v822_v37  ;;  %v1180_v35 = vand.u32 2147483647, %v822_v37 }
 0x347   :  { %v1155_v30 = vmul.f32 %v2091_v62, %v1154_v60  ;;  %v1158_v39 = vsub.f32 1.0, %v1157_v27  ;;  %vm1176_vm10 = vweird.f32 %v822_v37 }
 0x348   :  { %v1183_v5 = vor.u32 1.1754944e-38, %v1182_v25  ;;  %vm1181_vm12 = vcmp.eq.f32.partialorder %v1180_v35, 8.507059e+37 }
 0x349   :  { %1341 = vst [vmem:[%s2297_s3 + $0xa0] sm:$0xff] %v1155_v30  ;;  %v1159_v57 = vmul.f32 %v1585_v22, %v1158_v39 }
 0x34b   :  { %v1160_v53 = vadd.f32 %v1585_v22, %v1159_v57 }
 0x34c   :  { %v1587_v40 = vpop.eup %1586 }
 0x34d   :  { %v1164_v56 = vsel %vm1163_vm7, %v1585_v22, %v1160_v53  ;;  %v1172_v29 = vmul.f32 %v1587_v40, %v822_v37  ;;  %v824_v31 = vpop.xlane.xlu1 %823  ;;  %vm1177_vm9 = vweird.f32 %v1587_v40 }
 0x34e   :  { %v1169_v46 = vsel %vm1166_vm8, %v1168_v44, %v1164_v56  ;;  %1588 = vrcp.f32 %v824_v31  ;;  %vm1178_vm11 = vmor %vm1176_vm10, %vm1177_vm9  ;;  %v1197_v63 = vand.u32 2147483648, %v824_v31  ;;  %v1195_v49 = vand.u32 2147483647, %v824_v31 }
 0x34f   :  { %v1170_v62 = vmul.f32 %v2099_v24, %v1169_v46  ;;  %v1173_v21 = vsub.f32 1.0, %v1172_v29  ;;  %vm1191_vm14 = vweird.f32 %v824_v31 }
 0x350   :  { %v1198_v36 = vor.u32 1.1754944e-38, %v1197_v63  ;;  %vm1196_vm0 = vcmp.eq.f32.partialorder %v1195_v49, 8.507059e+37 }
 0x351   :  { %1342 = vst [vmem:[%s2297_s3 + $0xa8] sm:$0xff] %v1170_v62  ;;  %v1174_v26 = vmul.f32 %v1587_v40, %v1173_v21 }
 0x353   :  { %v1175_v32 = vadd.f32 %v1587_v40, %v1174_v26 }
 0x354   :  { %v1589_v45 = vpop.eup %1588 }
 0x355   :  { %v1179_v47 = vsel %vm1178_vm11, %v1587_v40, %v1175_v32  ;;  %v1187_v43 = vmul.f32 %v1589_v45, %v824_v31  ;;  %vm1192_vm13 = vweird.f32 %v1589_v45 }
 0x356   :  { %v1184_v14 = vsel %vm1181_vm12, %v1183_v5, %v1179_v47  ;;  %vm1193_vm15 = vmor %vm1191_vm14, %vm1192_vm13 }
 0x357   :  { %v1185_v24 = vmul.f32 %v2107_v20, %v1184_v14  ;;  %v1188_v33 = vsub.f32 1.0, %v1187_v43 }
 0x359   :  { %1343 = vst [vmem:[%s2297_s3 + $0xb0] sm:$0xff] %v1185_v24  ;;  %v1189_v15 = vmul.f32 %v1589_v45, %v1188_v33 }
 0x35b   :  { %v1190_v51 = vadd.f32 %v1589_v45, %v1189_v15  ;;  %v826_v50 = vpop.xlane.xlu2 %825 }
 0x35c   :  { %1590 = vrcp.f32 %v826_v50  ;;  %v1212_v58 = vand.u32 2147483648, %v826_v50  ;;  %v1210_v8 = vand.u32 2147483647, %v826_v50  ;;  %vm1206_vm2 = vweird.f32 %v826_v50 }
 0x35d   :  { %v1194_v4 = vsel %vm1193_vm15, %v1589_v45, %v1190_v51 }
 0x35e   :  { %v1199_v59 = vsel %vm1196_vm0, %v1198_v36, %v1194_v4  ;;  %v1213_v2 = vor.u32 1.1754944e-38, %v1212_v58  ;;  %vm1211_vm4 = vcmp.eq.f32.partialorder %v1210_v8, 8.507059e+37 }
 0x35f   :  { %v1200_v20 = vmul.f32 %v2114_v41, %v1199_v59 }
 0x361   :  { %1344 = vst [vmem:[%s2297_s3 + $0xb8] sm:$0xff] %v1200_v20 }
 0x362   :  { %v1591_v54 = vpop.eup %1590 }
 0x363   :  { %v1202_v12 = vmul.f32 %v1591_v54, %v826_v50  ;;  %v828_v52 = vpop.xlane.xlu0 %827  ;;  %vm1207_vm1 = vweird.f32 %v1591_v54 }
 0x364   :  { %1592 = vrcp.f32 %v828_v52  ;;  %vm1208_vm3 = vmor %vm1206_vm2, %vm1207_vm1  ;;  %v1227_v22 = vand.u32 2147483648, %v828_v52  ;;  %v1225_v16 = vand.u32 2147483647, %v828_v52  ;;  %vm1221_vm6 = vweird.f32 %v828_v52 }
 0x365   :  { %v1203_v19 = vsub.f32 1.0, %v1202_v12 }
 0x366   :  { %v1228_v60 = vor.u32 1.1754944e-38, %v1227_v22  ;;  %vm1226_vm8 = vcmp.eq.f32.partialorder %v1225_v16, 8.507059e+37 }
 0x367   :  { %v1204_v28 = vmul.f32 %v1591_v54, %v1203_v19 }
 0x369   :  { %v1205_v17 = vadd.f32 %v1591_v54, %v1204_v28 }
 0x36a   :  { %v1593_v10 = vpop.eup %1592 }
 0x36b   :  { %v1209_v7 = vsel %vm1208_vm3, %v1591_v54, %v1205_v17  ;;  %v1217_v41 = vmul.f32 %v1593_v10, %v828_v52  ;;  %v830_v1 = vpop.xlane.xlu1 %829  ;;  %vm1222_vm5 = vweird.f32 %v1593_v10 }
 0x36c   :  { %v1214_v0 = vsel %vm1211_vm4, %v1213_v2, %v1209_v7  ;;  %1594 = vrcp.f32 %v830_v1  ;;  %vm1223_vm7 = vmor %vm1221_vm6, %vm1222_vm5  ;;  %v1242_v53 = vand.u32 2147483648, %v830_v1  ;;  %v1240_v44 = vand.u32 2147483647, %v830_v1 }
 0x36d   :  { %v1215_v61 = vmul.f32 %v2126_v48, %v1214_v0  ;;  %v1218_v9 = vsub.f32 1.0, %v1217_v41  ;;  %vm1236_vm10 = vweird.f32 %v830_v1 }
 0x36e   :  { %v1243_v31 = vor.u32 1.1754944e-38, %v1242_v53  ;;  %vm1241_vm12 = vcmp.eq.f32.partialorder %v1240_v44, 8.507059e+37 }
 0x36f   :  { %1345 = vst [vmem:[%s2297_s3 + $0xc0] sm:$0xff] %v1215_v61  ;;  %v1219_v23 = vmul.f32 %v1593_v10, %v1218_v9 }
 0x371   :  { %v1220_v27 = vadd.f32 %v1593_v10, %v1219_v23 }
 0x372   :  { %v1595_v37 = vpop.eup %1594 }
 0x373   :  { %v1224_v30 = vsel %vm1223_vm7, %v1593_v10, %v1220_v27  ;;  %v1232_v39 = vmul.f32 %v1595_v37, %v830_v1  ;;  %v832_v11 = vpop.xlane.xlu2 %831  ;;  %vm1237_vm9 = vweird.f32 %v1595_v37 }
 0x374   :  { %v1229_v57 = vsel %vm1226_vm8, %v1228_v60, %v1224_v30  ;;  %1596 = vrcp.f32 %v832_v11  ;;  %vm1238_vm11 = vmor %vm1236_vm10, %vm1237_vm9  ;;  %v1257_v35 = vand.u32 2147483648, %v832_v11  ;;  %v1255_v45 = vand.u32 2147483647, %v832_v11 }
 0x375   :  { %v1230_v48 = vmul.f32 %v2134_v6, %v1229_v57  ;;  %v1233_v3 = vsub.f32 1.0, %v1232_v39  ;;  %vm1251_vm14 = vweird.f32 %v832_v11 }
 0x376   :  { %v1258_v43 = vor.u32 1.1754944e-38, %v1257_v35  ;;  %vm1256_vm0 = vcmp.eq.f32.partialorder %v1255_v45, 8.507059e+37 }
 0x377   :  { %1346 = vst [vmem:[%s2297_s3 + $0xc8] sm:$0xff] %v1230_v48  ;;  %v1234_v40 = vmul.f32 %v1595_v37, %v1233_v3 }
 0x379   :  { %v1235_v56 = vadd.f32 %v1595_v37, %v1234_v40 }
 0x37a   :  { %v1597_v29 = vpop.eup %1596 }
 0x37b   :  { %v1239_v46 = vsel %vm1238_vm11, %v1595_v37, %v1235_v56  ;;  %v1247_v62 = vmul.f32 %v1597_v29, %v832_v11  ;;  %v834_v21 = vpop.xlane.xlu0 %833  ;;  %vm1252_vm13 = vweird.f32 %v1597_v29 }
 0x37c   :  { %v1244_v25 = vsel %vm1241_vm12, %v1243_v31, %v1239_v46  ;;  %1598 = vrcp.f32 %v834_v21  ;;  %vm1253_vm15 = vmor %vm1251_vm14, %vm1252_vm13  ;;  %v1272_v49 = vand.u32 2147483648, %v834_v21  ;;  %v1270_v50 = vand.u32 2147483647, %v834_v21 }
 0x37d   :  { %v1245_v6 = vmul.f32 %v2142_v18, %v1244_v25  ;;  %v1248_v26 = vsub.f32 1.0, %v1247_v62  ;;  %vm1266_vm2 = vweird.f32 %v834_v21 }
 0x37e   :  { %v1273_v59 = vor.u32 1.1754944e-38, %v1272_v49  ;;  %vm1271_vm4 = vcmp.eq.f32.partialorder %v1270_v50, 8.507059e+37 }
 0x37f   :  { %1347 = vst [vmem:[%s2297_s3 + $0xd0] sm:$0xff] %v1245_v6  ;;  %v1249_v32 = vmul.f32 %v1597_v29, %v1248_v26 }
 0x381   :  { %v1250_v5 = vadd.f32 %v1597_v29, %v1249_v32 }
 0x382   :  { %v1599_v47 = vpop.eup %1598 }
 0x383   :  { %v1254_v14 = vsel %vm1253_vm15, %v1597_v29, %v1250_v5  ;;  %v1262_v24 = vmul.f32 %v1599_v47, %v834_v21  ;;  %v836_v33 = vpop.xlane.xlu1 %835  ;;  %vm1267_vm1 = vweird.f32 %v1599_v47 }
 0x384   :  { %v1259_v63 = vsel %vm1256_vm0, %v1258_v43, %v1254_v14  ;;  %1600 = vrcp.f32 %v836_v33  ;;  %vm1268_vm3 = vmor %vm1266_vm2, %vm1267_vm1  ;;  %v1287_v58 = vand.u32 2147483648, %v836_v33  ;;  %v1285_v8 = vand.u32 2147483647, %v836_v33 }
 0x385   :  { %v1260_v18 = vmul.f32 %v2150_v34, %v1259_v63  ;;  %v1263_v15 = vsub.f32 1.0, %v1262_v24  ;;  %vm1281_vm6 = vweird.f32 %v836_v33 }
 0x386   :  { %v1288_v10 = vor.u32 1.1754944e-38, %v1287_v58  ;;  %vm1286_vm8 = vcmp.eq.f32.partialorder %v1285_v8, 8.507059e+37 }
 0x387   :  { %1348 = vst [vmem:[%s2297_s3 + $0xd8] sm:$0xff] %v1260_v18  ;;  %v1264_v51 = vmul.f32 %v1599_v47, %v1263_v15 }
 0x389   :  { %v1265_v36 = vadd.f32 %v1599_v47, %v1264_v51 }
 0x38a   :  { %v1601_v4 = vpop.eup %1600 }
 0x38b   :  { %v1269_v20 = vsel %vm1268_vm3, %v1599_v47, %v1265_v36  ;;  %v1277_v54 = vmul.f32 %v1601_v4, %v836_v33  ;;  %v838_v52 = vpop.xlane.xlu2 %837  ;;  %vm1282_vm5 = vweird.f32 %v1601_v4 }
 0x38c   :  { %v1274_v12 = vsel %vm1271_vm4, %v1273_v59, %v1269_v20  ;;  %1602 = vrcp.f32 %v838_v52  ;;  %vm1283_vm7 = vmor %vm1281_vm6, %vm1282_vm5  ;;  %v1302_v9 = vand.u32 2147483648, %v838_v52  ;;  %v1300_v23 = vand.u32 2147483647, %v838_v52 }
 0x38d   :  { %v1275_v34 = vmul.f32 %v2154_v38, %v1274_v12  ;;  %v1278_v19 = vsub.f32 1.0, %v1277_v54  ;;  %vm1296_vm10 = vweird.f32 %v838_v52 }
 0x38e   :  { %v1303_v37 = vor.u32 1.1754944e-38, %v1302_v9  ;;  %vm1301_vm12 = vcmp.eq.f32.partialorder %v1300_v23, 8.507059e+37 }
 0x38f   :  { %1349 = vst [vmem:[%s2297_s3 + $0xe0] sm:$0xff] %v1275_v34  ;;  %v1279_v28 = vmul.f32 %v1601_v4, %v1278_v19 }
 0x391   :  { %v1280_v17 = vadd.f32 %v1601_v4, %v1279_v28 }
 0x392   :  { %v1603_v2 = vpop.eup %1602 }
 0x393   :  { %v1284_v7 = vsel %vm1283_vm7, %v1601_v4, %v1280_v17  ;;  %v840_v41 = vpop.xlane.xlu0 %839  ;;  %v1292_v38 = vmul.f32 %v1603_v2, %v838_v52  ;;  %vm1297_vm9 = vweird.f32 %v1603_v2 }
 0x394   :  { %v1289_v1 = vsel %vm1286_vm8, %v1288_v10, %v1284_v7  ;;  %1604 = vrcp.f32 %v840_v41  ;;  %vm1298_vm11 = vmor %vm1296_vm10, %vm1297_vm9  ;;  %v1317_v57 = vand.u32 2147483648, %v840_v41  ;;  %v1315_v3 = vand.u32 2147483647, %v840_v41 }
 0x395   :  { %v1290_v0 = vmul.f32 %v2158_v42, %v1289_v1  ;;  %v1293_v61 = vsub.f32 1.0, %v1292_v38  ;;  %vm1311_vm14 = vweird.f32 %v840_v41 }
 0x396   :  { %v1318_v40 = vor.u32 1.1754944e-38, %v1317_v57  ;;  %vm1316_vm0 = vcmp.eq.f32.partialorder %v1315_v3, 8.507059e+37 }
 0x397   :  { %1350 = vst [vmem:[%s2297_s3 + $0xe8] sm:$0xff] %v1290_v0  ;;  %v1294_v22 = vmul.f32 %v1603_v2, %v1293_v61 }
 0x399   :  { %v1295_v27 = vadd.f32 %v1603_v2, %v1294_v22 }
 0x39a   :  { %v1605_v16 = vpop.eup %1604 }
 0x39b   :  { %v1307_v60 = vmul.f32 %v1605_v16, %v840_v41  ;;  %v1299_v30 = vsel %vm1298_vm11, %v1603_v2, %v1295_v27  ;;  %vm1312_vm13 = vweird.f32 %v1605_v16 }
 0x39c   :  { %v1304_v39 = vsel %vm1301_vm12, %v1303_v37, %v1299_v30  ;;  %vm1313_vm15 = vmor %vm1311_vm14, %vm1312_vm13 }
 0x39d   :  { %v1308_v11 = vsub.f32 1.0, %v1307_v60  ;;  %v1305_v42 = vmul.f32 %v2162_v55, %v1304_v39 }
 0x39f   :  { %v1309_v48 = vmul.f32 %v1605_v16, %v1308_v11  ;;  %1351 = vst [vmem:[%s2297_s3 + $0xf0] sm:$0xff] %v1305_v42 }
 0x3a1   :  { %v1310_v53 = vadd.f32 %v1605_v16, %v1309_v48 }
 0x3a3   :  { %v1314_v44 = vsel %vm1313_vm15, %v1605_v16, %v1310_v53 }
 0x3a4   :  { %v1319_v56 = vsel %vm1316_vm0, %v1318_v40, %v1314_v44 }
 0x3a5   :  { %v1320_v29 = vmul.f32 %v2171_v13, %v1319_v56 }
 0x3a7   :  { %1352 = vst [vmem:[%s2297_s3 + $0xf8] sm:$0xff] %v1320_v29 }

</bundles_post_ra>
